<compile_context>
chip_gen: v5e
topology: v5e:2x2
jax: 0.10.0
libtpu: 0.0.40
codegen_flags: <defaults>
</compile_context>

<pallas_src>
import functools
import math

import numpy as np
import jax
import jax.numpy as jnp
from jax import lax
from jax.experimental import pallas as pl
from jax.experimental.pallas import tpu as pltpu

# ---------------- config ----------------
SEQ_LEN = 16
PRED_LEN = 8
ENC_IN = 4          # N variates
N_MARK = 3          # time-mark channels
D_MODEL = 32
N_HEADS = 4
D_FF = 64
E_LAYERS = 2
KERNEL_SIZE = 25


# ---------------- helpers ----------------
def _layer_norm(x, g, b, eps=1e-5):
    # PyTorch nn.LayerNorm: biased variance, eps inside sqrt.
    m = jnp.mean(x, axis=-1, keepdims=True)
    v = jnp.mean((x - m) ** 2, axis=-1, keepdims=True)
    return (x - m) * lax.rsqrt(v + eps) * g + b


@functools.lru_cache(maxsize=None)
def _host_constants(B, NV, NVP, N, L, kernel_size):
    """Hoisted constants: moving-average matrix, padded block-diag attention bias,
    padded variate-row mask. NVP = tokens-per-batch padded up to a multiple of 8."""
    half = kernel_size // 2
    idx = np.arange(L)
    # AvgPool1d(kernel, stride=1, pad=kernel//2, zero-pad, count_include_pad=True)
    # as a dense (symmetric) matrix.
    A = (np.abs(idx[:, None] - idx[None, :]) <= half).astype(np.float32) / kernel_size

    tok_batch = np.repeat(np.arange(B), NVP)                      # batch id per padded row
    key_real = np.tile(np.arange(NVP) < NV, B)                    # key column is a real token
    attn_bias = np.where(
        (tok_batch[:, None] == tok_batch[None, :]) & key_real[None, :],
        0.0, -1e9).astype(np.float32)                             # (B*NVP, B*NVP)

    is_var = np.tile((np.arange(NVP) < N).astype(np.float32), B)[:, None]  # (B*NVP, 1)
    return jnp.asarray(A), jnp.asarray(attn_bias), jnp.asarray(is_var)


# ---------------- the single fused kernel ----------------
def _fused_kernel(tok_ref, isvar_ref, bias_ref, a_ref,
                  emb_w_ref, emb_b_ref,
                  wqkv_ref, bqkv_ref, wo_ref, bo_ref,
                  g1_ref, be1_ref, w1_ref, b1_ref,
                  w2_ref, b2_ref, g2_ref, be2_ref,
                  gf_ref, bf_ref, wp_ref, bp_ref,
                  o_ref, *, n_heads, e_layers, pred_len):
    BT, L = tok_ref.shape                     # BT = batch * NVP (NVP multiple of 8)
    D = emb_w_ref.shape[1]
    dk = D // n_heads

    rows = tok_ref[...]                       # (BT, L): [variates ; marks ; pad] per batch
    A = a_ref[...]                            # (L, L) symmetric moving-average matrix

    # ---- series decomposition + instance normalization (row = one channel) ----
    trend = jnp.dot(rows, A, preferred_element_type=jnp.float32)      # (BT, L)
    seas = rows - trend
    mu = jnp.mean(seas, axis=-1, keepdims=True)                       # (BT, 1)
    ctr = seas - mu
    var = jnp.mean(ctr * ctr, axis=-1, keepdims=True)                 # unbiased=False
    inv_sd = lax.rsqrt(var + 1e-5)                                    # EUP (free slot)
    sd = jnp.sqrt(var + 1e-5)                                         # for de-norm epilogue
    seas_n = ctr * inv_sd

    # variate rows use normalized seasonality; mark/pad rows stay raw.
    is_var = isvar_ref[...]                                           # (BT, 1)
    emb_in = is_var * seas_n + (1.0 - is_var) * rows

    # ---- DataEmbedding_inverted: Linear(seq_len -> d_model), all tokens at once ----
    h = jnp.dot(emb_in, emb_w_ref[...],
                preferred_element_type=jnp.float32) + emb_b_ref[...]  # (BT, D)
    # TODO(synk): dropout layers are identity (eval mode), so they are omitted.

    attn_bias = bias_ref[...]                 # (BT, BT): block-diag + pad-key mask

    # ---- encoder layers (weights stacked along the leading E axis) ----
    for l in range(e_layers):
        # 1/sqrt(dk) attention scale is pre-folded into the Q weight/bias columns.
        qkv = jnp.dot(h, wqkv_ref[l],
                      preferred_element_type=jnp.float32) + bqkv_ref[l]   # (BT, 3D)
        q, k, v = qkv[:, :D], qkv[:, D:2 * D], qkv[:, 2 * D:]
        kT = jnp.transpose(k)                        # one XLU transpose per layer (D, BT)
        wo_l = wo_ref[l]                             # (D, D)

        attn = jnp.zeros((BT, D), jnp.float32)
        for hh in range(n_heads):                    # static aligned slices per head
            sl = slice(hh * dk, (hh + 1) * dk)
            s = jnp.dot(q[:, sl], kT[sl, :],
                        preferred_element_type=jnp.float32) + attn_bias   # (BT, BT)
            s = s - jnp.max(s, axis=-1, keepdims=True)
            p = jnp.exp(s)
            p = p * pl.reciprocal(jnp.sum(p, axis=-1, keepdims=True), approx=True)
            oh = jnp.dot(p, v[:, sl], preferred_element_type=jnp.float32)  # (BT, dk)
            # Fold Wo into the head loop (sublane-aligned 8-row weight slice):
            attn = attn + jnp.dot(oh, wo_l[sl, :], preferred_element_type=jnp.float32)
        attn = attn + bo_ref[l]

        x1 = _layer_norm(h + attn, g1_ref[l], be1_ref[l])                  # norm1
        y = jnp.dot(x1, w1_ref[l], preferred_element_type=jnp.float32) + b1_ref[l]
        y = jnp.maximum(y, 0.0)                                            # activation='relu'
        y = jnp.dot(y, w2_ref[l], preferred_element_type=jnp.float32) + b2_ref[l]
        h = _layer_norm(x1 + y, g2_ref[l], be2_ref[l])                     # norm2

    # ---- final encoder norm + projection + vectorized de-instance-norm ----
    hf = _layer_norm(h, gf_ref[...], bf_ref[...])                          # (BT, D)
    proj = jnp.dot(hf, wp_ref[...],
                   preferred_element_type=jnp.float32) + bp_ref[...]       # (BT, P)

    # One elementwise epilogue over all rows + one rank-2 store; variate-row
    # selection and the (B,N,P)->(B,P,N) transpose happen in the XLA wrapper.
    o_ref[...] = proj * sd + mu + trend[:, L - pred_len:]


# ---------------- parameters ----------------
def init_params(key):
    def w(k, shape, s=0.1):
        return s * jax.random.normal(k, shape, dtype=jnp.float32)

    dk = D_MODEL // N_HEADS
    scale = 1.0 / math.sqrt(dk)                    # FullAttention default 1/sqrt(E)

    keys = jax.random.split(key, 2 + E_LAYERS)
    params = {
        "emb_w": w(keys[0], (SEQ_LEN, D_MODEL)),
        "emb_b": jnp.zeros((1, D_MODEL), jnp.float32),
        "norm_g": jnp.ones((1, D_MODEL), jnp.float32),
        "norm_b": jnp.zeros((1, D_MODEL), jnp.float32),
        "proj_w": w(keys[1], (D_MODEL, PRED_LEN)),
        "proj_b": jnp.zeros((1, PRED_LEN), jnp.float32),
    }
    acc = {n: [] for n in ("wqkv", "bqkv", "wo", "bo", "g1", "be1",
                           "w1", "b1", "w2", "b2", "g2", "be2")}
    for l in range(E_LAYERS):
        lk = jax.random.split(keys[2 + l], 6)
        # Attention scale folded into Q weight/bias (mathematically identical).
        wq = w(lk[0], (D_MODEL, D_MODEL)) * scale
        wk = w(lk[1], (D_MODEL, D_MODEL))
        wv = w(lk[2], (D_MODEL, D_MODEL))
        bq = jnp.zeros((1, D_MODEL), jnp.float32) * scale
        bk = jnp.zeros((1, D_MODEL), jnp.float32)
        bv = jnp.zeros((1, D_MODEL), jnp.float32)
        acc["wqkv"].append(jnp.concatenate([wq, wk, wv], axis=1))          # (D, 3D)
        acc["bqkv"].append(jnp.concatenate([bq, bk, bv], axis=1))          # (1, 3D)
        acc["wo"].append(w(lk[3], (D_MODEL, D_MODEL)))
        acc["bo"].append(jnp.zeros((1, D_MODEL), jnp.float32))
        acc["g1"].append(jnp.ones((1, D_MODEL), jnp.float32))
        acc["be1"].append(jnp.zeros((1, D_MODEL), jnp.float32))
        acc["w1"].append(w(lk[4], (D_MODEL, D_FF)))
        acc["b1"].append(jnp.zeros((1, D_FF), jnp.float32))
        acc["w2"].append(w(lk[5], (D_FF, D_MODEL)))
        acc["b2"].append(jnp.zeros((1, D_MODEL), jnp.float32))
        acc["g2"].append(jnp.ones((1, D_MODEL), jnp.float32))
        acc["be2"].append(jnp.zeros((1, D_MODEL), jnp.float32))
    for name, lst in acc.items():
        params[name] = jnp.stack(lst, axis=0)                              # (E, ...)
    return params


# ---------------- full forward (task_name = 'long_term_forecast') ----------------
def edformer_forecast(params, x_enc, x_mark_enc, x_dec=None, x_mark_dec=None):
    B, L, N = x_enc.shape
    M = x_mark_enc.shape[-1]
    NV = N + M
    NVP = ((NV + 7) // 8) * 8                       # pad tokens/batch to sublane tile (8)
    A, attn_bias, is_var = _host_constants(B, NV, NVP, N, L, KERNEL_SIZE)

    # "Inverted" token layout: [B, L, N+M] -> [B, NVP, L] (zero dummy rows) -> [B*NVP, L].
    tok = jnp.transpose(jnp.concatenate([x_enc, x_mark_enc], axis=-1), (0, 2, 1))
    tok_in = jnp.pad(tok, ((0, 0), (0, NVP - NV), (0, 0))).reshape(B * NVP, L)

    kernel = functools.partial(_fused_kernel, n_heads=N_HEADS,
                               e_layers=E_LAYERS, pred_len=PRED_LEN)
    args = (tok_in, is_var, attn_bias, A,
            params["emb_w"], params["emb_b"],
            params["wqkv"], params["bqkv"], params["wo"], params["bo"],
            params["g1"], params["be1"], params["w1"], params["b1"],
            params["w2"], params["b2"], params["g2"], params["be2"],
            params["norm_g"], params["norm_b"], params["proj_w"], params["proj_b"])

    out_rows = pl.pallas_call(
        kernel,
        out_shape=jax.ShapeDtypeStruct((B * NVP, PRED_LEN), jnp.float32),
        in_specs=[pl.BlockSpec(memory_space=pltpu.MemorySpace.VMEM)] * len(args),
        out_specs=pl.BlockSpec(memory_space=pltpu.MemorySpace.VMEM),
    )(*args)                                                            # (B*NVP, P)

    # Variate-row selection + (B, N, P) -> (B, P, N); identical to the module's
    # final permute + [:, :, :N] slice.
    out = out_rows.reshape(B, NVP, PRED_LEN)[:, :N, :]
    return jnp.transpose(out, (0, 2, 1))


if __name__ == "__main__":
    key = jax.random.PRNGKey(0)
    kp, kx, km = jax.random.split(key, 3)
    params = init_params(kp)

    B = 2
    x_enc = jax.random.normal(kx, (B, SEQ_LEN, ENC_IN), dtype=jnp.float32)
    x_mark_enc = jax.random.normal(km, (B, SEQ_LEN, N_MARK), dtype=jnp.float32)
    x_dec = jnp.zeros((B, PRED_LEN, ENC_IN), jnp.float32)        # unused by forecast path
    x_mark_dec = jnp.zeros((B, PRED_LEN, N_MARK), jnp.float32)   # unused by forecast path

    out = jax.jit(edformer_forecast)(params, x_enc, x_mark_enc, x_dec, x_mark_dec)
    jax.block_until_ready(out)
    assert out.shape == (B, PRED_LEN, ENC_IN), out.shape
    assert bool(jnp.all(jnp.isfinite(out)))
    print("KERNEL_OK")
</pallas_src>

<mosaic_0001>
module attributes {stable_mosaic.version = 11 : i64} {
  func.func @_fused_kernel(%arg0: memref<16x16xf32, #tpu.memory_space<vmem>>, %arg1: memref<16x1xf32, #tpu.memory_space<vmem>>, %arg2: memref<16x16xf32, #tpu.memory_space<vmem>>, %arg3: memref<16x16xf32, #tpu.memory_space<vmem>>, %arg4: memref<16x32xf32, #tpu.memory_space<vmem>>, %arg5: memref<1x32xf32, #tpu.memory_space<vmem>>, %arg6: memref<2x32x96xf32, #tpu.memory_space<vmem>>, %arg7: memref<2x1x96xf32, #tpu.memory_space<vmem>>, %arg8: memref<2x32x32xf32, #tpu.memory_space<vmem>>, %arg9: memref<2x1x32xf32, #tpu.memory_space<vmem>>, %arg10: memref<2x1x32xf32, #tpu.memory_space<vmem>>, %arg11: memref<2x1x32xf32, #tpu.memory_space<vmem>>, %arg12: memref<2x32x64xf32, #tpu.memory_space<vmem>>, %arg13: memref<2x1x64xf32, #tpu.memory_space<vmem>>, %arg14: memref<2x64x32xf32, #tpu.memory_space<vmem>>, %arg15: memref<2x1x32xf32, #tpu.memory_space<vmem>>, %arg16: memref<2x1x32xf32, #tpu.memory_space<vmem>>, %arg17: memref<2x1x32xf32, #tpu.memory_space<vmem>>, %arg18: memref<1x32xf32, #tpu.memory_space<vmem>>, %arg19: memref<1x32xf32, #tpu.memory_space<vmem>>, %arg20: memref<32x8xf32, #tpu.memory_space<vmem>>, %arg21: memref<1x8xf32, #tpu.memory_space<vmem>>, %arg22: memref<16x8xf32, #tpu.memory_space<vmem>>) attributes {dimension_semantics = [], scalar_prefetch = 0 : i64, scratch_operands = 0 : i64, tpu.core_type = #tpu.core_type<tc>} {
    %c0 = arith.constant 0 : index
    %c0_0 = arith.constant 0 : index
    %0 = vector.load %arg0[%c0, %c0_0] : memref<16x16xf32, #tpu.memory_space<vmem>>, vector<16x16xf32>
    %c0_1 = arith.constant 0 : index
    %c0_2 = arith.constant 0 : index
    %1 = vector.load %arg3[%c0_1, %c0_2] : memref<16x16xf32, #tpu.memory_space<vmem>>, vector<16x16xf32>
    %cst = arith.constant dense<0.000000e+00> : vector<16x16xf32>
    %2 = tpu.matmul %0, %1, %cst {dimension_numbers = #tpu.dot_dimension_numbers<[1], [0], [0], [1], [0, 0, 1, 1], [], []>} : vector<16x16xf32>, vector<16x16xf32>, vector<16x16xf32> -> vector<16x16xf32>
    %3 = arith.subf %0, %2 : vector<16x16xf32>
    %cst_3 = arith.constant dense<0.000000e+00> : vector<16xf32>
    %4 = vector.multi_reduction <add>, %3, %cst_3 [1] : vector<16x16xf32> to vector<16xf32>
    %5 = vector.shape_cast %4 : vector<16xf32> to vector<16x1xf32>
    %cst_4 = arith.constant 1.600000e+01 : f32
    %6 = vector.broadcast %cst_4 : f32 to vector<16x1xf32>
    %7 = arith.divf %5, %6 : vector<16x1xf32>
    %8 = vector.broadcast %7 : vector<16x1xf32> to vector<16x16xf32>
    %9 = arith.subf %3, %8 : vector<16x16xf32>
    %10 = arith.mulf %9, %9 : vector<16x16xf32>
    %cst_5 = arith.constant dense<0.000000e+00> : vector<16xf32>
    %11 = vector.multi_reduction <add>, %10, %cst_5 [1] : vector<16x16xf32> to vector<16xf32>
    %12 = vector.shape_cast %11 : vector<16xf32> to vector<16x1xf32>
    %cst_6 = arith.constant 1.600000e+01 : f32
    %13 = vector.broadcast %cst_6 : f32 to vector<16x1xf32>
    %14 = arith.divf %12, %13 : vector<16x1xf32>
    %cst_7 = arith.constant 9.99999974E-6 : f32
    %15 = vector.broadcast %cst_7 : f32 to vector<16x1xf32>
    %16 = arith.addf %14, %15 : vector<16x1xf32>
    %17 = math.rsqrt %16 : vector<16x1xf32>
    %cst_8 = arith.constant 9.99999974E-6 : f32
    %18 = vector.broadcast %cst_8 : f32 to vector<16x1xf32>
    %19 = arith.addf %14, %18 : vector<16x1xf32>
    %20 = math.sqrt %19 : vector<16x1xf32>
    %21 = vector.broadcast %17 : vector<16x1xf32> to vector<16x16xf32>
    %22 = arith.mulf %9, %21 : vector<16x16xf32>
    %c0_9 = arith.constant 0 : index
    %c0_10 = arith.constant 0 : index
    %23 = vector.load %arg1[%c0_9, %c0_10] : memref<16x1xf32, #tpu.memory_space<vmem>>, vector<16x1xf32>
    %24 = vector.broadcast %23 : vector<16x1xf32> to vector<16x16xf32>
    %25 = arith.mulf %24, %22 : vector<16x16xf32>
    %cst_11 = arith.constant 1.000000e+00 : f32
    %26 = vector.broadcast %cst_11 : f32 to vector<16x1xf32>
    %27 = arith.subf %26, %23 : vector<16x1xf32>
    %28 = vector.broadcast %27 : vector<16x1xf32> to vector<16x16xf32>
    %29 = arith.mulf %28, %0 : vector<16x16xf32>
    %30 = arith.addf %25, %29 : vector<16x16xf32>
    %c0_12 = arith.constant 0 : index
    %c0_13 = arith.constant 0 : index
    %31 = vector.load %arg4[%c0_12, %c0_13] : memref<16x32xf32, #tpu.memory_space<vmem>>, vector<16x32xf32>
    %cst_14 = arith.constant dense<0.000000e+00> : vector<16x32xf32>
    %32 = tpu.matmul %30, %31, %cst_14 {dimension_numbers = #tpu.dot_dimension_numbers<[1], [0], [0], [1], [0, 0, 1, 1], [], []>} : vector<16x16xf32>, vector<16x32xf32>, vector<16x32xf32> -> vector<16x32xf32>
    %c0_15 = arith.constant 0 : index
    %c0_16 = arith.constant 0 : index
    %33 = vector.load %arg5[%c0_15, %c0_16] : memref<1x32xf32, #tpu.memory_space<vmem>>, vector<1x32xf32>
    %34 = vector.broadcast %33 : vector<1x32xf32> to vector<16x32xf32>
    %35 = arith.addf %32, %34 : vector<16x32xf32>
    %c0_17 = arith.constant 0 : index
    %c0_18 = arith.constant 0 : index
    %36 = vector.load %arg2[%c0_17, %c0_18] : memref<16x16xf32, #tpu.memory_space<vmem>>, vector<16x16xf32>
    %c0_19 = arith.constant 0 : index
    %c0_20 = arith.constant 0 : index
    %c0_21 = arith.constant 0 : index
    %37 = vector.load %arg6[%c0_19, %c0_20, %c0_21] : memref<2x32x96xf32, #tpu.memory_space<vmem>>, vector<1x32x96xf32>
    %38 = vector.shape_cast %37 : vector<1x32x96xf32> to vector<32x96xf32>
    %cst_22 = arith.constant dense<0.000000e+00> : vector<16x96xf32>
    %39 = tpu.matmul %35, %38, %cst_22 {dimension_numbers = #tpu.dot_dimension_numbers<[1], [0], [0], [1], [0, 0, 1, 1], [], []>} : vector<16x32xf32>, vector<32x96xf32>, vector<16x96xf32> -> vector<16x96xf32>
    %c0_23 = arith.constant 0 : index
    %c0_24 = arith.constant 0 : index
    %c0_25 = arith.constant 0 : index
    %40 = vector.load %arg7[%c0_23, %c0_24, %c0_25] : memref<2x1x96xf32, #tpu.memory_space<vmem>>, vector<1x1x96xf32>
    %41 = vector.shape_cast %40 : vector<1x1x96xf32> to vector<1x96xf32>
    %42 = vector.broadcast %41 : vector<1x96xf32> to vector<16x96xf32>
    %43 = arith.addf %39, %42 : vector<16x96xf32>
    %44 = vector.extract_strided_slice %43 {offsets = [0, 0], sizes = [16, 32], strides = [1, 1]} : vector<16x96xf32> to vector<16x32xf32>
    %45 = vector.extract_strided_slice %43 {offsets = [0, 32], sizes = [16, 32], strides = [1, 1]} : vector<16x96xf32> to vector<16x32xf32>
    %46 = vector.extract_strided_slice %43 {offsets = [0, 64], sizes = [16, 32], strides = [1, 1]} : vector<16x96xf32> to vector<16x32xf32>
    %47 = tpu.transpose %45, [1, 0] : vector<16x32xf32> -> vector<32x16xf32>
    %c0_26 = arith.constant 0 : index
    %c0_27 = arith.constant 0 : index
    %c0_28 = arith.constant 0 : index
    %48 = vector.load %arg8[%c0_26, %c0_27, %c0_28] : memref<2x32x32xf32, #tpu.memory_space<vmem>>, vector<1x32x32xf32>
    %49 = vector.shape_cast %48 : vector<1x32x32xf32> to vector<32x32xf32>
    %cst_29 = arith.constant 0.000000e+00 : f32
    %50 = vector.broadcast %cst_29 : f32 to vector<16x32xf32>
    %51 = vector.extract_strided_slice %44 {offsets = [0, 0], sizes = [16, 8], strides = [1, 1]} : vector<16x32xf32> to vector<16x8xf32>
    %52 = vector.extract_strided_slice %47 {offsets = [0, 0], sizes = [8, 16], strides = [1, 1]} : vector<32x16xf32> to vector<8x16xf32>
    %cst_30 = arith.constant dense<0.000000e+00> : vector<16x16xf32>
    %53 = tpu.matmul %51, %52, %cst_30 {dimension_numbers = #tpu.dot_dimension_numbers<[1], [0], [0], [1], [0, 0, 1, 1], [], []>} : vector<16x8xf32>, vector<8x16xf32>, vector<16x16xf32> -> vector<16x16xf32>
    %54 = arith.addf %53, %36 : vector<16x16xf32>
    %cst_31 = arith.constant dense<0xFF800000> : vector<16xf32>
    %55 = vector.multi_reduction <maximumf>, %54, %cst_31 [1] : vector<16x16xf32> to vector<16xf32>
    %56 = vector.shape_cast %55 : vector<16xf32> to vector<16x1xf32>
    %57 = vector.broadcast %56 : vector<16x1xf32> to vector<16x16xf32>
    %58 = arith.subf %54, %57 : vector<16x16xf32>
    %59 = math.exp %58 : vector<16x16xf32>
    %cst_32 = arith.constant dense<0.000000e+00> : vector<16xf32>
    %60 = vector.multi_reduction <add>, %59, %cst_32 [1] : vector<16x16xf32> to vector<16xf32>
    %61 = vector.shape_cast %60 : vector<16xf32> to vector<16x1xf32>
    %62 = tpu.reciprocal %61 {approx = true} : vector<16x1xf32> -> vector<16x1xf32>
    %63 = vector.broadcast %62 : vector<16x1xf32> to vector<16x16xf32>
    %64 = arith.mulf %59, %63 : vector<16x16xf32>
    %65 = vector.extract_strided_slice %46 {offsets = [0, 0], sizes = [16, 8], strides = [1, 1]} : vector<16x32xf32> to vector<16x8xf32>
    %cst_33 = arith.constant dense<0.000000e+00> : vector<16x8xf32>
    %66 = tpu.matmul %64, %65, %cst_33 {dimension_numbers = #tpu.dot_dimension_numbers<[1], [0], [0], [1], [0, 0, 1, 1], [], []>} : vector<16x16xf32>, vector<16x8xf32>, vector<16x8xf32> -> vector<16x8xf32>
    %67 = vector.extract_strided_slice %49 {offsets = [0, 0], sizes = [8, 32], strides = [1, 1]} : vector<32x32xf32> to vector<8x32xf32>
    %cst_34 = arith.constant dense<0.000000e+00> : vector<16x32xf32>
    %68 = tpu.matmul %66, %67, %cst_34 {dimension_numbers = #tpu.dot_dimension_numbers<[1], [0], [0], [1], [0, 0, 1, 1], [], []>} : vector<16x8xf32>, vector<8x32xf32>, vector<16x32xf32> -> vector<16x32xf32>
    %69 = arith.addf %50, %68 : vector<16x32xf32>
    %70 = vector.extract_strided_slice %44 {offsets = [0, 8], sizes = [16, 8], strides = [1, 1]} : vector<16x32xf32> to vector<16x8xf32>
    %71 = vector.extract_strided_slice %47 {offsets = [8, 0], sizes = [8, 16], strides = [1, 1]} : vector<32x16xf32> to vector<8x16xf32>
    %cst_35 = arith.constant dense<0.000000e+00> : vector<16x16xf32>
    %72 = tpu.matmul %70, %71, %cst_35 {dimension_numbers = #tpu.dot_dimension_numbers<[1], [0], [0], [1], [0, 0, 1, 1], [], []>} : vector<16x8xf32>, vector<8x16xf32>, vector<16x16xf32> -> vector<16x16xf32>
    %73 = arith.addf %72, %36 : vector<16x16xf32>
    %cst_36 = arith.constant dense<0xFF800000> : vector<16xf32>
    %74 = vector.multi_reduction <maximumf>, %73, %cst_36 [1] : vector<16x16xf32> to vector<16xf32>
    %75 = vector.shape_cast %74 : vector<16xf32> to vector<16x1xf32>
    %76 = vector.broadcast %75 : vector<16x1xf32> to vector<16x16xf32>
    %77 = arith.subf %73, %76 : vector<16x16xf32>
    %78 = math.exp %77 : vector<16x16xf32>
    %cst_37 = arith.constant dense<0.000000e+00> : vector<16xf32>
    %79 = vector.multi_reduction <add>, %78, %cst_37 [1] : vector<16x16xf32> to vector<16xf32>
    %80 = vector.shape_cast %79 : vector<16xf32> to vector<16x1xf32>
    %81 = tpu.reciprocal %80 {approx = true} : vector<16x1xf32> -> vector<16x1xf32>
    %82 = vector.broadcast %81 : vector<16x1xf32> to vector<16x16xf32>
    %83 = arith.mulf %78, %82 : vector<16x16xf32>
    %84 = vector.extract_strided_slice %46 {offsets = [0, 8], sizes = [16, 8], strides = [1, 1]} : vector<16x32xf32> to vector<16x8xf32>
    %cst_38 = arith.constant dense<0.000000e+00> : vector<16x8xf32>
    %85 = tpu.matmul %83, %84, %cst_38 {dimension_numbers = #tpu.dot_dimension_numbers<[1], [0], [0], [1], [0, 0, 1, 1], [], []>} : vector<16x16xf32>, vector<16x8xf32>, vector<16x8xf32> -> vector<16x8xf32>
    %86 = vector.extract_strided_slice %49 {offsets = [8, 0], sizes = [8, 32], strides = [1, 1]} : vector<32x32xf32> to vector<8x32xf32>
    %cst_39 = arith.constant dense<0.000000e+00> : vector<16x32xf32>
    %87 = tpu.matmul %85, %86, %cst_39 {dimension_numbers = #tpu.dot_dimension_numbers<[1], [0], [0], [1], [0, 0, 1, 1], [], []>} : vector<16x8xf32>, vector<8x32xf32>, vector<16x32xf32> -> vector<16x32xf32>
    %88 = arith.addf %69, %87 : vector<16x32xf32>
    %89 = vector.extract_strided_slice %44 {offsets = [0, 16], sizes = [16, 8], strides = [1, 1]} : vector<16x32xf32> to vector<16x8xf32>
    %90 = vector.extract_strided_slice %47 {offsets = [16, 0], sizes = [8, 16], strides = [1, 1]} : vector<32x16xf32> to vector<8x16xf32>
    %cst_40 = arith.constant dense<0.000000e+00> : vector<16x16xf32>
    %91 = tpu.matmul %89, %90, %cst_40 {dimension_numbers = #tpu.dot_dimension_numbers<[1], [0], [0], [1], [0, 0, 1, 1], [], []>} : vector<16x8xf32>, vector<8x16xf32>, vector<16x16xf32> -> vector<16x16xf32>
    %92 = arith.addf %91, %36 : vector<16x16xf32>
    %cst_41 = arith.constant dense<0xFF800000> : vector<16xf32>
    %93 = vector.multi_reduction <maximumf>, %92, %cst_41 [1] : vector<16x16xf32> to vector<16xf32>
    %94 = vector.shape_cast %93 : vector<16xf32> to vector<16x1xf32>
    %95 = vector.broadcast %94 : vector<16x1xf32> to vector<16x16xf32>
    %96 = arith.subf %92, %95 : vector<16x16xf32>
    %97 = math.exp %96 : vector<16x16xf32>
    %cst_42 = arith.constant dense<0.000000e+00> : vector<16xf32>
    %98 = vector.multi_reduction <add>, %97, %cst_42 [1] : vector<16x16xf32> to vector<16xf32>
    %99 = vector.shape_cast %98 : vector<16xf32> to vector<16x1xf32>
    %100 = tpu.reciprocal %99 {approx = true} : vector<16x1xf32> -> vector<16x1xf32>
    %101 = vector.broadcast %100 : vector<16x1xf32> to vector<16x16xf32>
    %102 = arith.mulf %97, %101 : vector<16x16xf32>
    %103 = vector.extract_strided_slice %46 {offsets = [0, 16], sizes = [16, 8], strides = [1, 1]} : vector<16x32xf32> to vector<16x8xf32>
    %cst_43 = arith.constant dense<0.000000e+00> : vector<16x8xf32>
    %104 = tpu.matmul %102, %103, %cst_43 {dimension_numbers = #tpu.dot_dimension_numbers<[1], [0], [0], [1], [0, 0, 1, 1], [], []>} : vector<16x16xf32>, vector<16x8xf32>, vector<16x8xf32> -> vector<16x8xf32>
    %105 = vector.extract_strided_slice %49 {offsets = [16, 0], sizes = [8, 32], strides = [1, 1]} : vector<32x32xf32> to vector<8x32xf32>
    %cst_44 = arith.constant dense<0.000000e+00> : vector<16x32xf32>
    %106 = tpu.matmul %104, %105, %cst_44 {dimension_numbers = #tpu.dot_dimension_numbers<[1], [0], [0], [1], [0, 0, 1, 1], [], []>} : vector<16x8xf32>, vector<8x32xf32>, vector<16x32xf32> -> vector<16x32xf32>
    %107 = arith.addf %88, %106 : vector<16x32xf32>
    %108 = vector.extract_strided_slice %44 {offsets = [0, 24], sizes = [16, 8], strides = [1, 1]} : vector<16x32xf32> to vector<16x8xf32>
    %109 = vector.extract_strided_slice %47 {offsets = [24, 0], sizes = [8, 16], strides = [1, 1]} : vector<32x16xf32> to vector<8x16xf32>
    %cst_45 = arith.constant dense<0.000000e+00> : vector<16x16xf32>
    %110 = tpu.matmul %108, %109, %cst_45 {dimension_numbers = #tpu.dot_dimension_numbers<[1], [0], [0], [1], [0, 0, 1, 1], [], []>} : vector<16x8xf32>, vector<8x16xf32>, vector<16x16xf32> -> vector<16x16xf32>
    %111 = arith.addf %110, %36 : vector<16x16xf32>
    %cst_46 = arith.constant dense<0xFF800000> : vector<16xf32>
    %112 = vector.multi_reduction <maximumf>, %111, %cst_46 [1] : vector<16x16xf32> to vector<16xf32>
    %113 = vector.shape_cast %112 : vector<16xf32> to vector<16x1xf32>
    %114 = vector.broadcast %113 : vector<16x1xf32> to vector<16x16xf32>
    %115 = arith.subf %111, %114 : vector<16x16xf32>
    %116 = math.exp %115 : vector<16x16xf32>
    %cst_47 = arith.constant dense<0.000000e+00> : vector<16xf32>
    %117 = vector.multi_reduction <add>, %116, %cst_47 [1] : vector<16x16xf32> to vector<16xf32>
    %118 = vector.shape_cast %117 : vector<16xf32> to vector<16x1xf32>
    %119 = tpu.reciprocal %118 {approx = true} : vector<16x1xf32> -> vector<16x1xf32>
    %120 = vector.broadcast %119 : vector<16x1xf32> to vector<16x16xf32>
    %121 = arith.mulf %116, %120 : vector<16x16xf32>
    %122 = vector.extract_strided_slice %46 {offsets = [0, 24], sizes = [16, 8], strides = [1, 1]} : vector<16x32xf32> to vector<16x8xf32>
    %cst_48 = arith.constant dense<0.000000e+00> : vector<16x8xf32>
    %123 = tpu.matmul %121, %122, %cst_48 {dimension_numbers = #tpu.dot_dimension_numbers<[1], [0], [0], [1], [0, 0, 1, 1], [], []>} : vector<16x16xf32>, vector<16x8xf32>, vector<16x8xf32> -> vector<16x8xf32>
    %124 = vector.extract_strided_slice %49 {offsets = [24, 0], sizes = [8, 32], strides = [1, 1]} : vector<32x32xf32> to vector<8x32xf32>
    %cst_49 = arith.constant dense<0.000000e+00> : vector<16x32xf32>
    %125 = tpu.matmul %123, %124, %cst_49 {dimension_numbers = #tpu.dot_dimension_numbers<[1], [0], [0], [1], [0, 0, 1, 1], [], []>} : vector<16x8xf32>, vector<8x32xf32>, vector<16x32xf32> -> vector<16x32xf32>
    %126 = arith.addf %107, %125 : vector<16x32xf32>
    %c0_50 = arith.constant 0 : index
    %c0_51 = arith.constant 0 : index
    %c0_52 = arith.constant 0 : index
    %127 = vector.load %arg9[%c0_50, %c0_51, %c0_52] : memref<2x1x32xf32, #tpu.memory_space<vmem>>, vector<1x1x32xf32>
    %128 = vector.shape_cast %127 : vector<1x1x32xf32> to vector<1x32xf32>
    %129 = vector.broadcast %128 : vector<1x32xf32> to vector<16x32xf32>
    %130 = arith.addf %126, %129 : vector<16x32xf32>
    %131 = arith.addf %35, %130 : vector<16x32xf32>
    %c0_53 = arith.constant 0 : index
    %c0_54 = arith.constant 0 : index
    %c0_55 = arith.constant 0 : index
    %132 = vector.load %arg10[%c0_53, %c0_54, %c0_55] : memref<2x1x32xf32, #tpu.memory_space<vmem>>, vector<1x1x32xf32>
    %133 = vector.shape_cast %132 : vector<1x1x32xf32> to vector<1x32xf32>
    %c0_56 = arith.constant 0 : index
    %c0_57 = arith.constant 0 : index
    %c0_58 = arith.constant 0 : index
    %134 = vector.load %arg11[%c0_56, %c0_57, %c0_58] : memref<2x1x32xf32, #tpu.memory_space<vmem>>, vector<1x1x32xf32>
    %135 = vector.shape_cast %134 : vector<1x1x32xf32> to vector<1x32xf32>
    %cst_59 = arith.constant dense<0.000000e+00> : vector<16xf32>
    %136 = vector.multi_reduction <add>, %131, %cst_59 [1] : vector<16x32xf32> to vector<16xf32>
    %137 = vector.shape_cast %136 : vector<16xf32> to vector<16x1xf32>
    %cst_60 = arith.constant 3.200000e+01 : f32
    %138 = vector.broadcast %cst_60 : f32 to vector<16x1xf32>
    %139 = arith.divf %137, %138 : vector<16x1xf32>
    %140 = vector.broadcast %139 : vector<16x1xf32> to vector<16x32xf32>
    %141 = arith.subf %131, %140 : vector<16x32xf32>
    %142 = arith.mulf %141, %141 : vector<16x32xf32>
    %cst_61 = arith.constant dense<0.000000e+00> : vector<16xf32>
    %143 = vector.multi_reduction <add>, %142, %cst_61 [1] : vector<16x32xf32> to vector<16xf32>
    %144 = vector.shape_cast %143 : vector<16xf32> to vector<16x1xf32>
    %cst_62 = arith.constant 3.200000e+01 : f32
    %145 = vector.broadcast %cst_62 : f32 to vector<16x1xf32>
    %146 = arith.divf %144, %145 : vector<16x1xf32>
    %147 = vector.broadcast %139 : vector<16x1xf32> to vector<16x32xf32>
    %148 = arith.subf %131, %147 : vector<16x32xf32>
    %cst_63 = arith.constant 9.99999974E-6 : f32
    %149 = vector.broadcast %cst_63 : f32 to vector<16x1xf32>
    %150 = arith.addf %146, %149 : vector<16x1xf32>
    %151 = math.rsqrt %150 : vector<16x1xf32>
    %152 = vector.broadcast %151 : vector<16x1xf32> to vector<16x32xf32>
    %153 = arith.mulf %148, %152 : vector<16x32xf32>
    %154 = vector.broadcast %133 : vector<1x32xf32> to vector<16x32xf32>
    %155 = arith.mulf %153, %154 : vector<16x32xf32>
    %156 = vector.broadcast %135 : vector<1x32xf32> to vector<16x32xf32>
    %157 = arith.addf %155, %156 : vector<16x32xf32>
    %c0_64 = arith.constant 0 : index
    %c0_65 = arith.constant 0 : index
    %c0_66 = arith.constant 0 : index
    %158 = vector.load %arg12[%c0_64, %c0_65, %c0_66] : memref<2x32x64xf32, #tpu.memory_space<vmem>>, vector<1x32x64xf32>
    %159 = vector.shape_cast %158 : vector<1x32x64xf32> to vector<32x64xf32>
    %cst_67 = arith.constant dense<0.000000e+00> : vector<16x64xf32>
    %160 = tpu.matmul %157, %159, %cst_67 {dimension_numbers = #tpu.dot_dimension_numbers<[1], [0], [0], [1], [0, 0, 1, 1], [], []>} : vector<16x32xf32>, vector<32x64xf32>, vector<16x64xf32> -> vector<16x64xf32>
    %c0_68 = arith.constant 0 : index
    %c0_69 = arith.constant 0 : index
    %c0_70 = arith.constant 0 : index
    %161 = vector.load %arg13[%c0_68, %c0_69, %c0_70] : memref<2x1x64xf32, #tpu.memory_space<vmem>>, vector<1x1x64xf32>
    %162 = vector.shape_cast %161 : vector<1x1x64xf32> to vector<1x64xf32>
    %163 = vector.broadcast %162 : vector<1x64xf32> to vector<16x64xf32>
    %164 = arith.addf %160, %163 : vector<16x64xf32>
    %cst_71 = arith.constant 0.000000e+00 : f32
    %165 = vector.broadcast %cst_71 : f32 to vector<16x64xf32>
    %166 = arith.maximumf %164, %165 : vector<16x64xf32>
    %c0_72 = arith.constant 0 : index
    %c0_73 = arith.constant 0 : index
    %c0_74 = arith.constant 0 : index
    %167 = vector.load %arg14[%c0_72, %c0_73, %c0_74] : memref<2x64x32xf32, #tpu.memory_space<vmem>>, vector<1x64x32xf32>
    %168 = vector.shape_cast %167 : vector<1x64x32xf32> to vector<64x32xf32>
    %cst_75 = arith.constant dense<0.000000e+00> : vector<16x32xf32>
    %169 = tpu.matmul %166, %168, %cst_75 {dimension_numbers = #tpu.dot_dimension_numbers<[1], [0], [0], [1], [0, 0, 1, 1], [], []>} : vector<16x64xf32>, vector<64x32xf32>, vector<16x32xf32> -> vector<16x32xf32>
    %c0_76 = arith.constant 0 : index
    %c0_77 = arith.constant 0 : index
    %c0_78 = arith.constant 0 : index
    %170 = vector.load %arg15[%c0_76, %c0_77, %c0_78] : memref<2x1x32xf32, #tpu.memory_space<vmem>>, vector<1x1x32xf32>
    %171 = vector.shape_cast %170 : vector<1x1x32xf32> to vector<1x32xf32>
    %172 = vector.broadcast %171 : vector<1x32xf32> to vector<16x32xf32>
    %173 = arith.addf %169, %172 : vector<16x32xf32>
    %174 = arith.addf %157, %173 : vector<16x32xf32>
    %c0_79 = arith.constant 0 : index
    %c0_80 = arith.constant 0 : index
    %c0_81 = arith.constant 0 : index
    %175 = vector.load %arg16[%c0_79, %c0_80, %c0_81] : memref<2x1x32xf32, #tpu.memory_space<vmem>>, vector<1x1x32xf32>
    %176 = vector.shape_cast %175 : vector<1x1x32xf32> to vector<1x32xf32>
    %c0_82 = arith.constant 0 : index
    %c0_83 = arith.constant 0 : index
    %c0_84 = arith.constant 0 : index
    %177 = vector.load %arg17[%c0_82, %c0_83, %c0_84] : memref<2x1x32xf32, #tpu.memory_space<vmem>>, vector<1x1x32xf32>
    %178 = vector.shape_cast %177 : vector<1x1x32xf32> to vector<1x32xf32>
    %cst_85 = arith.constant dense<0.000000e+00> : vector<16xf32>
    %179 = vector.multi_reduction <add>, %174, %cst_85 [1] : vector<16x32xf32> to vector<16xf32>
    %180 = vector.shape_cast %179 : vector<16xf32> to vector<16x1xf32>
    %cst_86 = arith.constant 3.200000e+01 : f32
    %181 = vector.broadcast %cst_86 : f32 to vector<16x1xf32>
    %182 = arith.divf %180, %181 : vector<16x1xf32>
    %183 = vector.broadcast %182 : vector<16x1xf32> to vector<16x32xf32>
    %184 = arith.subf %174, %183 : vector<16x32xf32>
    %185 = arith.mulf %184, %184 : vector<16x32xf32>
    %cst_87 = arith.constant dense<0.000000e+00> : vector<16xf32>
    %186 = vector.multi_reduction <add>, %185, %cst_87 [1] : vector<16x32xf32> to vector<16xf32>
    %187 = vector.shape_cast %186 : vector<16xf32> to vector<16x1xf32>
    %cst_88 = arith.constant 3.200000e+01 : f32
    %188 = vector.broadcast %cst_88 : f32 to vector<16x1xf32>
    %189 = arith.divf %187, %188 : vector<16x1xf32>
    %190 = vector.broadcast %182 : vector<16x1xf32> to vector<16x32xf32>
    %191 = arith.subf %174, %190 : vector<16x32xf32>
    %cst_89 = arith.constant 9.99999974E-6 : f32
    %192 = vector.broadcast %cst_89 : f32 to vector<16x1xf32>
    %193 = arith.addf %189, %192 : vector<16x1xf32>
    %194 = math.rsqrt %193 : vector<16x1xf32>
    %195 = vector.broadcast %194 : vector<16x1xf32> to vector<16x32xf32>
    %196 = arith.mulf %191, %195 : vector<16x32xf32>
    %197 = vector.broadcast %176 : vector<1x32xf32> to vector<16x32xf32>
    %198 = arith.mulf %196, %197 : vector<16x32xf32>
    %199 = vector.broadcast %178 : vector<1x32xf32> to vector<16x32xf32>
    %200 = arith.addf %198, %199 : vector<16x32xf32>
    %c1 = arith.constant 1 : index
    %c0_90 = arith.constant 0 : index
    %c0_91 = arith.constant 0 : index
    %201 = vector.load %arg6[%c1, %c0_90, %c0_91] : memref<2x32x96xf32, #tpu.memory_space<vmem>>, vector<1x32x96xf32>
    %202 = vector.shape_cast %201 : vector<1x32x96xf32> to vector<32x96xf32>
    %cst_92 = arith.constant dense<0.000000e+00> : vector<16x96xf32>
    %203 = tpu.matmul %200, %202, %cst_92 {dimension_numbers = #tpu.dot_dimension_numbers<[1], [0], [0], [1], [0, 0, 1, 1], [], []>} : vector<16x32xf32>, vector<32x96xf32>, vector<16x96xf32> -> vector<16x96xf32>
    %c1_93 = arith.constant 1 : index
    %c0_94 = arith.constant 0 : index
    %c0_95 = arith.constant 0 : index
    %204 = vector.load %arg7[%c1_93, %c0_94, %c0_95] : memref<2x1x96xf32, #tpu.memory_space<vmem>>, vector<1x1x96xf32>
    %205 = vector.shape_cast %204 : vector<1x1x96xf32> to vector<1x96xf32>
    %206 = vector.broadcast %205 : vector<1x96xf32> to vector<16x96xf32>
    %207 = arith.addf %203, %206 : vector<16x96xf32>
    %208 = vector.extract_strided_slice %207 {offsets = [0, 0], sizes = [16, 32], strides = [1, 1]} : vector<16x96xf32> to vector<16x32xf32>
    %209 = vector.extract_strided_slice %207 {offsets = [0, 32], sizes = [16, 32], strides = [1, 1]} : vector<16x96xf32> to vector<16x32xf32>
    %210 = vector.extract_strided_slice %207 {offsets = [0, 64], sizes = [16, 32], strides = [1, 1]} : vector<16x96xf32> to vector<16x32xf32>
    %211 = tpu.transpose %209, [1, 0] : vector<16x32xf32> -> vector<32x16xf32>
    %c1_96 = arith.constant 1 : index
    %c0_97 = arith.constant 0 : index
    %c0_98 = arith.constant 0 : index
    %212 = vector.load %arg8[%c1_96, %c0_97, %c0_98] : memref<2x32x32xf32, #tpu.memory_space<vmem>>, vector<1x32x32xf32>
    %213 = vector.shape_cast %212 : vector<1x32x32xf32> to vector<32x32xf32>
    %cst_99 = arith.constant 0.000000e+00 : f32
    %214 = vector.broadcast %cst_99 : f32 to vector<16x32xf32>
    %215 = vector.extract_strided_slice %208 {offsets = [0, 0], sizes = [16, 8], strides = [1, 1]} : vector<16x32xf32> to vector<16x8xf32>
    %216 = vector.extract_strided_slice %211 {offsets = [0, 0], sizes = [8, 16], strides = [1, 1]} : vector<32x16xf32> to vector<8x16xf32>
    %cst_100 = arith.constant dense<0.000000e+00> : vector<16x16xf32>
    %217 = tpu.matmul %215, %216, %cst_100 {dimension_numbers = #tpu.dot_dimension_numbers<[1], [0], [0], [1], [0, 0, 1, 1], [], []>} : vector<16x8xf32>, vector<8x16xf32>, vector<16x16xf32> -> vector<16x16xf32>
    %218 = arith.addf %217, %36 : vector<16x16xf32>
    %cst_101 = arith.constant dense<0xFF800000> : vector<16xf32>
    %219 = vector.multi_reduction <maximumf>, %218, %cst_101 [1] : vector<16x16xf32> to vector<16xf32>
    %220 = vector.shape_cast %219 : vector<16xf32> to vector<16x1xf32>
    %221 = vector.broadcast %220 : vector<16x1xf32> to vector<16x16xf32>
    %222 = arith.subf %218, %221 : vector<16x16xf32>
    %223 = math.exp %222 : vector<16x16xf32>
    %cst_102 = arith.constant dense<0.000000e+00> : vector<16xf32>
    %224 = vector.multi_reduction <add>, %223, %cst_102 [1] : vector<16x16xf32> to vector<16xf32>
    %225 = vector.shape_cast %224 : vector<16xf32> to vector<16x1xf32>
    %226 = tpu.reciprocal %225 {approx = true} : vector<16x1xf32> -> vector<16x1xf32>
    %227 = vector.broadcast %226 : vector<16x1xf32> to vector<16x16xf32>
    %228 = arith.mulf %223, %227 : vector<16x16xf32>
    %229 = vector.extract_strided_slice %210 {offsets = [0, 0], sizes = [16, 8], strides = [1, 1]} : vector<16x32xf32> to vector<16x8xf32>
    %cst_103 = arith.constant dense<0.000000e+00> : vector<16x8xf32>
    %230 = tpu.matmul %228, %229, %cst_103 {dimension_numbers = #tpu.dot_dimension_numbers<[1], [0], [0], [1], [0, 0, 1, 1], [], []>} : vector<16x16xf32>, vector<16x8xf32>, vector<16x8xf32> -> vector<16x8xf32>
    %231 = vector.extract_strided_slice %213 {offsets = [0, 0], sizes = [8, 32], strides = [1, 1]} : vector<32x32xf32> to vector<8x32xf32>
    %cst_104 = arith.constant dense<0.000000e+00> : vector<16x32xf32>
    %232 = tpu.matmul %230, %231, %cst_104 {dimension_numbers = #tpu.dot_dimension_numbers<[1], [0], [0], [1], [0, 0, 1, 1], [], []>} : vector<16x8xf32>, vector<8x32xf32>, vector<16x32xf32> -> vector<16x32xf32>
    %233 = arith.addf %214, %232 : vector<16x32xf32>
    %234 = vector.extract_strided_slice %208 {offsets = [0, 8], sizes = [16, 8], strides = [1, 1]} : vector<16x32xf32> to vector<16x8xf32>
    %235 = vector.extract_strided_slice %211 {offsets = [8, 0], sizes = [8, 16], strides = [1, 1]} : vector<32x16xf32> to vector<8x16xf32>
    %cst_105 = arith.constant dense<0.000000e+00> : vector<16x16xf32>
    %236 = tpu.matmul %234, %235, %cst_105 {dimension_numbers = #tpu.dot_dimension_numbers<[1], [0], [0], [1], [0, 0, 1, 1], [], []>} : vector<16x8xf32>, vector<8x16xf32>, vector<16x16xf32> -> vector<16x16xf32>
    %237 = arith.addf %236, %36 : vector<16x16xf32>
    %cst_106 = arith.constant dense<0xFF800000> : vector<16xf32>
    %238 = vector.multi_reduction <maximumf>, %237, %cst_106 [1] : vector<16x16xf32> to vector<16xf32>
    %239 = vector.shape_cast %238 : vector<16xf32> to vector<16x1xf32>
    %240 = vector.broadcast %239 : vector<16x1xf32> to vector<16x16xf32>
    %241 = arith.subf %237, %240 : vector<16x16xf32>
    %242 = math.exp %241 : vector<16x16xf32>
    %cst_107 = arith.constant dense<0.000000e+00> : vector<16xf32>
    %243 = vector.multi_reduction <add>, %242, %cst_107 [1] : vector<16x16xf32> to vector<16xf32>
    %244 = vector.shape_cast %243 : vector<16xf32> to vector<16x1xf32>
    %245 = tpu.reciprocal %244 {approx = true} : vector<16x1xf32> -> vector<16x1xf32>
    %246 = vector.broadcast %245 : vector<16x1xf32> to vector<16x16xf32>
    %247 = arith.mulf %242, %246 : vector<16x16xf32>
    %248 = vector.extract_strided_slice %210 {offsets = [0, 8], sizes = [16, 8], strides = [1, 1]} : vector<16x32xf32> to vector<16x8xf32>
    %cst_108 = arith.constant dense<0.000000e+00> : vector<16x8xf32>
    %249 = tpu.matmul %247, %248, %cst_108 {dimension_numbers = #tpu.dot_dimension_numbers<[1], [0], [0], [1], [0, 0, 1, 1], [], []>} : vector<16x16xf32>, vector<16x8xf32>, vector<16x8xf32> -> vector<16x8xf32>
    %250 = vector.extract_strided_slice %213 {offsets = [8, 0], sizes = [8, 32], strides = [1, 1]} : vector<32x32xf32> to vector<8x32xf32>
    %cst_109 = arith.constant dense<0.000000e+00> : vector<16x32xf32>
    %251 = tpu.matmul %249, %250, %cst_109 {dimension_numbers = #tpu.dot_dimension_numbers<[1], [0], [0], [1], [0, 0, 1, 1], [], []>} : vector<16x8xf32>, vector<8x32xf32>, vector<16x32xf32> -> vector<16x32xf32>
    %252 = arith.addf %233, %251 : vector<16x32xf32>
    %253 = vector.extract_strided_slice %208 {offsets = [0, 16], sizes = [16, 8], strides = [1, 1]} : vector<16x32xf32> to vector<16x8xf32>
    %254 = vector.extract_strided_slice %211 {offsets = [16, 0], sizes = [8, 16], strides = [1, 1]} : vector<32x16xf32> to vector<8x16xf32>
    %cst_110 = arith.constant dense<0.000000e+00> : vector<16x16xf32>
    %255 = tpu.matmul %253, %254, %cst_110 {dimension_numbers = #tpu.dot_dimension_numbers<[1], [0], [0], [1], [0, 0, 1, 1], [], []>} : vector<16x8xf32>, vector<8x16xf32>, vector<16x16xf32> -> vector<16x16xf32>
    %256 = arith.addf %255, %36 : vector<16x16xf32>
    %cst_111 = arith.constant dense<0xFF800000> : vector<16xf32>
    %257 = vector.multi_reduction <maximumf>, %256, %cst_111 [1] : vector<16x16xf32> to vector<16xf32>
    %258 = vector.shape_cast %257 : vector<16xf32> to vector<16x1xf32>
    %259 = vector.broadcast %258 : vector<16x1xf32> to vector<16x16xf32>
    %260 = arith.subf %256, %259 : vector<16x16xf32>
    %261 = math.exp %260 : vector<16x16xf32>
    %cst_112 = arith.constant dense<0.000000e+00> : vector<16xf32>
    %262 = vector.multi_reduction <add>, %261, %cst_112 [1] : vector<16x16xf32> to vector<16xf32>
    %263 = vector.shape_cast %262 : vector<16xf32> to vector<16x1xf32>
    %264 = tpu.reciprocal %263 {approx = true} : vector<16x1xf32> -> vector<16x1xf32>
    %265 = vector.broadcast %264 : vector<16x1xf32> to vector<16x16xf32>
    %266 = arith.mulf %261, %265 : vector<16x16xf32>
    %267 = vector.extract_strided_slice %210 {offsets = [0, 16], sizes = [16, 8], strides = [1, 1]} : vector<16x32xf32> to vector<16x8xf32>
    %cst_113 = arith.constant dense<0.000000e+00> : vector<16x8xf32>
    %268 = tpu.matmul %266, %267, %cst_113 {dimension_numbers = #tpu.dot_dimension_numbers<[1], [0], [0], [1], [0, 0, 1, 1], [], []>} : vector<16x16xf32>, vector<16x8xf32>, vector<16x8xf32> -> vector<16x8xf32>
    %269 = vector.extract_strided_slice %213 {offsets = [16, 0], sizes = [8, 32], strides = [1, 1]} : vector<32x32xf32> to vector<8x32xf32>
    %cst_114 = arith.constant dense<0.000000e+00> : vector<16x32xf32>
    %270 = tpu.matmul %268, %269, %cst_114 {dimension_numbers = #tpu.dot_dimension_numbers<[1], [0], [0], [1], [0, 0, 1, 1], [], []>} : vector<16x8xf32>, vector<8x32xf32>, vector<16x32xf32> -> vector<16x32xf32>
    %271 = arith.addf %252, %270 : vector<16x32xf32>
    %272 = vector.extract_strided_slice %208 {offsets = [0, 24], sizes = [16, 8], strides = [1, 1]} : vector<16x32xf32> to vector<16x8xf32>
    %273 = vector.extract_strided_slice %211 {offsets = [24, 0], sizes = [8, 16], strides = [1, 1]} : vector<32x16xf32> to vector<8x16xf32>
    %cst_115 = arith.constant dense<0.000000e+00> : vector<16x16xf32>
    %274 = tpu.matmul %272, %273, %cst_115 {dimension_numbers = #tpu.dot_dimension_numbers<[1], [0], [0], [1], [0, 0, 1, 1], [], []>} : vector<16x8xf32>, vector<8x16xf32>, vector<16x16xf32> -> vector<16x16xf32>
    %275 = arith.addf %274, %36 : vector<16x16xf32>
    %cst_116 = arith.constant dense<0xFF800000> : vector<16xf32>
    %276 = vector.multi_reduction <maximumf>, %275, %cst_116 [1] : vector<16x16xf32> to vector<16xf32>
    %277 = vector.shape_cast %276 : vector<16xf32> to vector<16x1xf32>
    %278 = vector.broadcast %277 : vector<16x1xf32> to vector<16x16xf32>
    %279 = arith.subf %275, %278 : vector<16x16xf32>
    %280 = math.exp %279 : vector<16x16xf32>
    %cst_117 = arith.constant dense<0.000000e+00> : vector<16xf32>
    %281 = vector.multi_reduction <add>, %280, %cst_117 [1] : vector<16x16xf32> to vector<16xf32>
    %282 = vector.shape_cast %281 : vector<16xf32> to vector<16x1xf32>
    %283 = tpu.reciprocal %282 {approx = true} : vector<16x1xf32> -> vector<16x1xf32>
    %284 = vector.broadcast %283 : vector<16x1xf32> to vector<16x16xf32>
    %285 = arith.mulf %280, %284 : vector<16x16xf32>
    %286 = vector.extract_strided_slice %210 {offsets = [0, 24], sizes = [16, 8], strides = [1, 1]} : vector<16x32xf32> to vector<16x8xf32>
    %cst_118 = arith.constant dense<0.000000e+00> : vector<16x8xf32>
    %287 = tpu.matmul %285, %286, %cst_118 {dimension_numbers = #tpu.dot_dimension_numbers<[1], [0], [0], [1], [0, 0, 1, 1], [], []>} : vector<16x16xf32>, vector<16x8xf32>, vector<16x8xf32> -> vector<16x8xf32>
    %288 = vector.extract_strided_slice %213 {offsets = [24, 0], sizes = [8, 32], strides = [1, 1]} : vector<32x32xf32> to vector<8x32xf32>
    %cst_119 = arith.constant dense<0.000000e+00> : vector<16x32xf32>
    %289 = tpu.matmul %287, %288, %cst_119 {dimension_numbers = #tpu.dot_dimension_numbers<[1], [0], [0], [1], [0, 0, 1, 1], [], []>} : vector<16x8xf32>, vector<8x32xf32>, vector<16x32xf32> -> vector<16x32xf32>
    %290 = arith.addf %271, %289 : vector<16x32xf32>
    %c1_120 = arith.constant 1 : index
    %c0_121 = arith.constant 0 : index
    %c0_122 = arith.constant 0 : index
    %291 = vector.load %arg9[%c1_120, %c0_121, %c0_122] : memref<2x1x32xf32, #tpu.memory_space<vmem>>, vector<1x1x32xf32>
    %292 = vector.shape_cast %291 : vector<1x1x32xf32> to vector<1x32xf32>
    %293 = vector.broadcast %292 : vector<1x32xf32> to vector<16x32xf32>
    %294 = arith.addf %290, %293 : vector<16x32xf32>
    %295 = arith.addf %200, %294 : vector<16x32xf32>
    %c1_123 = arith.constant 1 : index
    %c0_124 = arith.constant 0 : index
    %c0_125 = arith.constant 0 : index
    %296 = vector.load %arg10[%c1_123, %c0_124, %c0_125] : memref<2x1x32xf32, #tpu.memory_space<vmem>>, vector<1x1x32xf32>
    %297 = vector.shape_cast %296 : vector<1x1x32xf32> to vector<1x32xf32>
    %c1_126 = arith.constant 1 : index
    %c0_127 = arith.constant 0 : index
    %c0_128 = arith.constant 0 : index
    %298 = vector.load %arg11[%c1_126, %c0_127, %c0_128] : memref<2x1x32xf32, #tpu.memory_space<vmem>>, vector<1x1x32xf32>
    %299 = vector.shape_cast %298 : vector<1x1x32xf32> to vector<1x32xf32>
    %cst_129 = arith.constant dense<0.000000e+00> : vector<16xf32>
    %300 = vector.multi_reduction <add>, %295, %cst_129 [1] : vector<16x32xf32> to vector<16xf32>
    %301 = vector.shape_cast %300 : vector<16xf32> to vector<16x1xf32>
    %cst_130 = arith.constant 3.200000e+01 : f32
    %302 = vector.broadcast %cst_130 : f32 to vector<16x1xf32>
    %303 = arith.divf %301, %302 : vector<16x1xf32>
    %304 = vector.broadcast %303 : vector<16x1xf32> to vector<16x32xf32>
    %305 = arith.subf %295, %304 : vector<16x32xf32>
    %306 = arith.mulf %305, %305 : vector<16x32xf32>
    %cst_131 = arith.constant dense<0.000000e+00> : vector<16xf32>
    %307 = vector.multi_reduction <add>, %306, %cst_131 [1] : vector<16x32xf32> to vector<16xf32>
    %308 = vector.shape_cast %307 : vector<16xf32> to vector<16x1xf32>
    %cst_132 = arith.constant 3.200000e+01 : f32
    %309 = vector.broadcast %cst_132 : f32 to vector<16x1xf32>
    %310 = arith.divf %308, %309 : vector<16x1xf32>
    %311 = vector.broadcast %303 : vector<16x1xf32> to vector<16x32xf32>
    %312 = arith.subf %295, %311 : vector<16x32xf32>
    %cst_133 = arith.constant 9.99999974E-6 : f32
    %313 = vector.broadcast %cst_133 : f32 to vector<16x1xf32>
    %314 = arith.addf %310, %313 : vector<16x1xf32>
    %315 = math.rsqrt %314 : vector<16x1xf32>
    %316 = vector.broadcast %315 : vector<16x1xf32> to vector<16x32xf32>
    %317 = arith.mulf %312, %316 : vector<16x32xf32>
    %318 = vector.broadcast %297 : vector<1x32xf32> to vector<16x32xf32>
    %319 = arith.mulf %317, %318 : vector<16x32xf32>
    %320 = vector.broadcast %299 : vector<1x32xf32> to vector<16x32xf32>
    %321 = arith.addf %319, %320 : vector<16x32xf32>
    %c1_134 = arith.constant 1 : index
    %c0_135 = arith.constant 0 : index
    %c0_136 = arith.constant 0 : index
    %322 = vector.load %arg12[%c1_134, %c0_135, %c0_136] : memref<2x32x64xf32, #tpu.memory_space<vmem>>, vector<1x32x64xf32>
    %323 = vector.shape_cast %322 : vector<1x32x64xf32> to vector<32x64xf32>
    %cst_137 = arith.constant dense<0.000000e+00> : vector<16x64xf32>
    %324 = tpu.matmul %321, %323, %cst_137 {dimension_numbers = #tpu.dot_dimension_numbers<[1], [0], [0], [1], [0, 0, 1, 1], [], []>} : vector<16x32xf32>, vector<32x64xf32>, vector<16x64xf32> -> vector<16x64xf32>
    %c1_138 = arith.constant 1 : index
    %c0_139 = arith.constant 0 : index
    %c0_140 = arith.constant 0 : index
    %325 = vector.load %arg13[%c1_138, %c0_139, %c0_140] : memref<2x1x64xf32, #tpu.memory_space<vmem>>, vector<1x1x64xf32>
    %326 = vector.shape_cast %325 : vector<1x1x64xf32> to vector<1x64xf32>
    %327 = vector.broadcast %326 : vector<1x64xf32> to vector<16x64xf32>
    %328 = arith.addf %324, %327 : vector<16x64xf32>
    %cst_141 = arith.constant 0.000000e+00 : f32
    %329 = vector.broadcast %cst_141 : f32 to vector<16x64xf32>
    %330 = arith.maximumf %328, %329 : vector<16x64xf32>
    %c1_142 = arith.constant 1 : index
    %c0_143 = arith.constant 0 : index
    %c0_144 = arith.constant 0 : index
    %331 = vector.load %arg14[%c1_142, %c0_143, %c0_144] : memref<2x64x32xf32, #tpu.memory_space<vmem>>, vector<1x64x32xf32>
    %332 = vector.shape_cast %331 : vector<1x64x32xf32> to vector<64x32xf32>
    %cst_145 = arith.constant dense<0.000000e+00> : vector<16x32xf32>
    %333 = tpu.matmul %330, %332, %cst_145 {dimension_numbers = #tpu.dot_dimension_numbers<[1], [0], [0], [1], [0, 0, 1, 1], [], []>} : vector<16x64xf32>, vector<64x32xf32>, vector<16x32xf32> -> vector<16x32xf32>
    %c1_146 = arith.constant 1 : index
    %c0_147 = arith.constant 0 : index
    %c0_148 = arith.constant 0 : index
    %334 = vector.load %arg15[%c1_146, %c0_147, %c0_148] : memref<2x1x32xf32, #tpu.memory_space<vmem>>, vector<1x1x32xf32>
    %335 = vector.shape_cast %334 : vector<1x1x32xf32> to vector<1x32xf32>
    %336 = vector.broadcast %335 : vector<1x32xf32> to vector<16x32xf32>
    %337 = arith.addf %333, %336 : vector<16x32xf32>
    %338 = arith.addf %321, %337 : vector<16x32xf32>
    %c1_149 = arith.constant 1 : index
    %c0_150 = arith.constant 0 : index
    %c0_151 = arith.constant 0 : index
    %339 = vector.load %arg16[%c1_149, %c0_150, %c0_151] : memref<2x1x32xf32, #tpu.memory_space<vmem>>, vector<1x1x32xf32>
    %340 = vector.shape_cast %339 : vector<1x1x32xf32> to vector<1x32xf32>
    %c1_152 = arith.constant 1 : index
    %c0_153 = arith.constant 0 : index
    %c0_154 = arith.constant 0 : index
    %341 = vector.load %arg17[%c1_152, %c0_153, %c0_154] : memref<2x1x32xf32, #tpu.memory_space<vmem>>, vector<1x1x32xf32>
    %342 = vector.shape_cast %341 : vector<1x1x32xf32> to vector<1x32xf32>
    %cst_155 = arith.constant dense<0.000000e+00> : vector<16xf32>
    %343 = vector.multi_reduction <add>, %338, %cst_155 [1] : vector<16x32xf32> to vector<16xf32>
    %344 = vector.shape_cast %343 : vector<16xf32> to vector<16x1xf32>
    %cst_156 = arith.constant 3.200000e+01 : f32
    %345 = vector.broadcast %cst_156 : f32 to vector<16x1xf32>
    %346 = arith.divf %344, %345 : vector<16x1xf32>
    %347 = vector.broadcast %346 : vector<16x1xf32> to vector<16x32xf32>
    %348 = arith.subf %338, %347 : vector<16x32xf32>
    %349 = arith.mulf %348, %348 : vector<16x32xf32>
    %cst_157 = arith.constant dense<0.000000e+00> : vector<16xf32>
    %350 = vector.multi_reduction <add>, %349, %cst_157 [1] : vector<16x32xf32> to vector<16xf32>
    %351 = vector.shape_cast %350 : vector<16xf32> to vector<16x1xf32>
    %cst_158 = arith.constant 3.200000e+01 : f32
    %352 = vector.broadcast %cst_158 : f32 to vector<16x1xf32>
    %353 = arith.divf %351, %352 : vector<16x1xf32>
    %354 = vector.broadcast %346 : vector<16x1xf32> to vector<16x32xf32>
    %355 = arith.subf %338, %354 : vector<16x32xf32>
    %cst_159 = arith.constant 9.99999974E-6 : f32
    %356 = vector.broadcast %cst_159 : f32 to vector<16x1xf32>
    %357 = arith.addf %353, %356 : vector<16x1xf32>
    %358 = math.rsqrt %357 : vector<16x1xf32>
    %359 = vector.broadcast %358 : vector<16x1xf32> to vector<16x32xf32>
    %360 = arith.mulf %355, %359 : vector<16x32xf32>
    %361 = vector.broadcast %340 : vector<1x32xf32> to vector<16x32xf32>
    %362 = arith.mulf %360, %361 : vector<16x32xf32>
    %363 = vector.broadcast %342 : vector<1x32xf32> to vector<16x32xf32>
    %364 = arith.addf %362, %363 : vector<16x32xf32>
    %c0_160 = arith.constant 0 : index
    %c0_161 = arith.constant 0 : index
    %365 = vector.load %arg18[%c0_160, %c0_161] : memref<1x32xf32, #tpu.memory_space<vmem>>, vector<1x32xf32>
    %c0_162 = arith.constant 0 : index
    %c0_163 = arith.constant 0 : index
    %366 = vector.load %arg19[%c0_162, %c0_163] : memref<1x32xf32, #tpu.memory_space<vmem>>, vector<1x32xf32>
    %cst_164 = arith.constant dense<0.000000e+00> : vector<16xf32>
    %367 = vector.multi_reduction <add>, %364, %cst_164 [1] : vector<16x32xf32> to vector<16xf32>
    %368 = vector.shape_cast %367 : vector<16xf32> to vector<16x1xf32>
    %cst_165 = arith.constant 3.200000e+01 : f32
    %369 = vector.broadcast %cst_165 : f32 to vector<16x1xf32>
    %370 = arith.divf %368, %369 : vector<16x1xf32>
    %371 = vector.broadcast %370 : vector<16x1xf32> to vector<16x32xf32>
    %372 = arith.subf %364, %371 : vector<16x32xf32>
    %373 = arith.mulf %372, %372 : vector<16x32xf32>
    %cst_166 = arith.constant dense<0.000000e+00> : vector<16xf32>
    %374 = vector.multi_reduction <add>, %373, %cst_166 [1] : vector<16x32xf32> to vector<16xf32>
    %375 = vector.shape_cast %374 : vector<16xf32> to vector<16x1xf32>
    %cst_167 = arith.constant 3.200000e+01 : f32
    %376 = vector.broadcast %cst_167 : f32 to vector<16x1xf32>
    %377 = arith.divf %375, %376 : vector<16x1xf32>
    %378 = vector.broadcast %370 : vector<16x1xf32> to vector<16x32xf32>
    %379 = arith.subf %364, %378 : vector<16x32xf32>
    %cst_168 = arith.constant 9.99999974E-6 : f32
    %380 = vector.broadcast %cst_168 : f32 to vector<16x1xf32>
    %381 = arith.addf %377, %380 : vector<16x1xf32>
    %382 = math.rsqrt %381 : vector<16x1xf32>
    %383 = vector.broadcast %382 : vector<16x1xf32> to vector<16x32xf32>
    %384 = arith.mulf %379, %383 : vector<16x32xf32>
    %385 = vector.broadcast %365 : vector<1x32xf32> to vector<16x32xf32>
    %386 = arith.mulf %384, %385 : vector<16x32xf32>
    %387 = vector.broadcast %366 : vector<1x32xf32> to vector<16x32xf32>
    %388 = arith.addf %386, %387 : vector<16x32xf32>
    %c0_169 = arith.constant 0 : index
    %c0_170 = arith.constant 0 : index
    %389 = vector.load %arg20[%c0_169, %c0_170] : memref<32x8xf32, #tpu.memory_space<vmem>>, vector<32x8xf32>
    %cst_171 = arith.constant dense<0.000000e+00> : vector<16x8xf32>
    %390 = tpu.matmul %388, %389, %cst_171 {dimension_numbers = #tpu.dot_dimension_numbers<[1], [0], [0], [1], [0, 0, 1, 1], [], []>} : vector<16x32xf32>, vector<32x8xf32>, vector<16x8xf32> -> vector<16x8xf32>
    %c0_172 = arith.constant 0 : index
    %c0_173 = arith.constant 0 : index
    %391 = vector.load %arg21[%c0_172, %c0_173] : memref<1x8xf32, #tpu.memory_space<vmem>>, vector<1x8xf32>
    %392 = vector.broadcast %391 : vector<1x8xf32> to vector<16x8xf32>
    %393 = arith.addf %390, %392 : vector<16x8xf32>
    %394 = vector.broadcast %20 : vector<16x1xf32> to vector<16x8xf32>
    %395 = arith.mulf %393, %394 : vector<16x8xf32>
    %396 = vector.broadcast %7 : vector<16x1xf32> to vector<16x8xf32>
    %397 = arith.addf %395, %396 : vector<16x8xf32>
    %398 = vector.extract_strided_slice %2 {offsets = [0, 8], sizes = [16, 8], strides = [1, 1]} : vector<16x16xf32> to vector<16x8xf32>
    %399 = arith.addf %397, %398 : vector<16x8xf32>
    %c0_174 = arith.constant 0 : index
    %c0_175 = arith.constant 0 : index
    %400 = vector.load %arg22[%c0_174, %c0_175] : memref<16x8xf32, #tpu.memory_space<vmem>>, vector<16x8xf32>
    tpu.vector_store %arg22[%c0_174, %c0_175], %399 {strides = array<i32>} : memref<16x8xf32, #tpu.memory_space<vmem>>, vector<16x8xf32>,
    return
  }
}

</mosaic_0001>

<bundles_post_ra>
// kernel: edformer_forecast.1
= control target key start
LH: loop header
LB: loop body
LE: loop exit
PB: predicated region body
PF: predicated region fallthrough
CT: control target
= control target key end

     0   :  { %s3138_s0 = inlined_call_operand.vmem [shape: f32[16,16], index: 0, kind: input, shape index: {}]   ;;  %s3139_s1 = inlined_call_operand.vmem [shape: f32[16,1], index: 1, kind: input, shape index: {}]   ;;  %s3140_s2 = inlined_call_operand.hbm [shape: f32[16,16], index: 2, kind: input, shape index: {}]   ;;  %s3141_s3 = inlined_call_operand.hbm [shape: f32[16,16], index: 3, kind: input, shape index: {}]   ;;  %s3142_s4 = inlined_call_operand.vmem [shape: f32[16,32], index: 4, kind: input, shape index: {}]   ;;  %s3143_s5 = inlined_call_operand.vmem [shape: f32[1,32], index: 5, kind: input, shape index: {}]   ;;  %s3144_s6 = inlined_call_operand.vmem [shape: f32[2,32,96], index: 6, kind: input, shape index: {}]   ;;  %s3145_s7 = inlined_call_operand.vmem [shape: f32[2,1,96], index: 7, kind: input, shape index: {}]   ;;  %s3146_s8 = inlined_call_operand.vmem [shape: f32[2,32,32], index: 8, kind: input, shape index: {}]   ;;  %s3147_s9 = inlined_call_operand.vmem [shape: f32[2,1,32], index: 9, kind: input, shape index: {}]   ;;  %s3148_s10 = inlined_call_operand.vmem [shape: f32[2,1,32], index: 10, kind: input, shape index: {}]   ;;  %s3149_s11 = inlined_call_operand.vmem [shape: f32[2,1,32], index: 11, kind: input, shape index: {}]   ;;  %s3150_s12 = inlined_call_operand.vmem [shape: f32[2,32,64], index: 12, kind: input, shape index: {}]   ;;  %s3151_s13 = inlined_call_operand.vmem [shape: f32[2,1,64], index: 13, kind: input, shape index: {}]   ;;  %s3152_s14 = inlined_call_operand.vmem [shape: f32[2,64,32], index: 14, kind: input, shape index: {}]   ;;  %s3153_s15 = inlined_call_operand.hbm [shape: f32[2,1,32], index: 15, kind: input, shape index: {}]   ;;  %s3154_s16 = inlined_call_operand.hbm [shape: f32[2,1,32], index: 16, kind: input, shape index: {}]   ;;  %s3155_s17 = inlined_call_operand.hbm [shape: f32[2,1,32], index: 17, kind: input, shape index: {}]   ;;  %s3156_s18 = inlined_call_operand.hbm [shape: f32[1,32], index: 18, kind: input, shape index: {}]   ;;  %s3157_s19 = inlined_call_operand.hbm [shape: f32[1,32], index: 19, kind: input, shape index: {}]   ;;  %s3158_s20 = inlined_call_operand.vmem [shape: f32[32,8], index: 20, kind: input, shape index: {}]   ;;  %s3159_s21 = inlined_call_operand.hbm [shape: f32[1,8], index: 21, kind: input, shape index: {}]   ;;  %s3160_s22 = inlined_call_operand.vmem [shape: f32[16,8], index: 22, kind: output, shape index: {}]  }
   0x1   :  { %3168 = sst [smem:[#allocation20_spill]] %s3138_s0 }
   0x2   :  { %3169 = sst [smem:[#allocation21_spill]] %s3139_s1 }
   0x3   :  { %3170 = sst [smem:[#allocation22_spill]] %s3140_s2 }
   0x4   :  { %3171 = sst [smem:[#allocation23_spill]] %s3141_s3 }
   0x5   :  { %3172 = sst [smem:[#allocation24_spill]] %s3142_s4 }
   0x6   :  { %3173 = sst [smem:[#allocation25_spill]] %s3143_s5 }
   0x7   :  { %3174 = sst [smem:[#allocation26_spill]] %s3144_s6 }
   0x8   :  { %3175 = sst [smem:[#allocation27_spill]] %s3151_s13 }
   0x9   :  { %3176 = sst [smem:[#allocation28_spill]] %s3158_s20 }
   0xa   :  { %3177 = sst [smem:[#allocation29_spill]] %s3160_s22 }
   0xb   :  { %27 = vsyncpa [#allocation3], 0 }
   0xc   :  { %28 = vsyncpa [#allocation5], 0 }
   0xd   :  { %29 = vsyncpa [#allocation8], 0 }
   0xe   :  { %30 = vsyncpa [#allocation11], 0 }
   0xf   :  { %31 = vsyncpa [#allocation14], 0  ;;  %s3178_s29 = sld [smem:[#allocation23_spill]]  ;;  %s2492_s4 = smov [#allocation4]  }
  0x10   :  { %s55_s0 = sshll.u32 %s2492_s4, 4  ;;  %s2493_s23 = smov 128   ;;  %s56_s0 = int_to_ptr.vmem [resolvable:$true] %s55_s0 }
  0x11   :  { %s2494_s1 = smov 8   ;;  %s101_s6 = sshll.u32 %s3154_s16, 4  ;;  %s102_s6 = int_to_ptr.hbm [resolvable:$true] %s101_s6 }
  0x12   :  { %s2495_s25 = smov [#allocation7]   ;;  %s128_s22 = sshll.u32 %s3156_s18, 4  ;;  %s129_s22 = int_to_ptr.hbm [resolvable:$true] %s128_s22 }
  0x13   :  { %s103_s26 = sshll.u32 %s2495_s25, 4  ;;  %s2496_s3 = smov 16   ;;  %s104_s26 = int_to_ptr.vmem [resolvable:$true] %s103_s26 }
  0x14   :  { %s2497_s28 = smov 1   ;;  %s3179_s20 = sld [smem:[#allocation22_spill]] }
  0x15   :  { %s53_s30 = sshll.u32 %s3178_s29, 4  ;;  %s2499_s16 = smov [#allocation2]   ;;  %s54_s30 = int_to_ptr.hbm [resolvable:$true] %s53_s30 }
  0x16   :  { %61 = dma.hbm_to_vmem [thread:$0]  %s54_s30, 256, %s56_s0, [#allocation5], %s2493_s23, %s2493_s23, %s2494_s1  }
  0x17   :  { %109 = dma.hbm_to_vmem [thread:$0]  %s102_s6, 32, %s104_s26, [#allocation8], %s2496_s3, %s2496_s3, %s2497_s28  }
  0x18   :  { %s2498_s0 = smov [#allocation10]   ;;  %s42_s5 = sshll.u32 %s2499_s16, 4  ;;  %s43_s5 = int_to_ptr.vmem [resolvable:$true] %s42_s5 }
  0x19   :  { %s130_s13 = sshll.u32 %s2498_s0, 4  ;;  %s88_s18 = sshll.u32 %s3153_s15, 4  ;;  %s131_s13 = int_to_ptr.vmem [resolvable:$true] %s130_s13  ;;  %s89_s18 = int_to_ptr.hbm [resolvable:$true] %s88_s18 }
  0x1a   :  { %s40_s30 = sshll.u32 %s3179_s20, 4  ;;  %s114_s26 = sshll.u32 %s3155_s17, 4  ;;  %s41_s30 = int_to_ptr.hbm [resolvable:$true] %s40_s30  ;;  %s115_s26 = int_to_ptr.hbm [resolvable:$true] %s114_s26 }
  0x1b   :  { %133 = dma.hbm_to_vmem [thread:$0]  %s129_s22, 16, %s131_s13, [#allocation11]  }
  0x1c   :  { %48 = dma.hbm_to_vmem [thread:$0]  %s41_s30, 256, %s43_s5, [#allocation3], %s2493_s23, %s2493_s23, %s2494_s1  }
  0x1d   :  { %s2500_s27 = smov [#allocation6]   ;;  %s2501_s29 = smov [#allocation9]  }
  0x1e   :  { %s90_s20 = sshll.u32 %s2500_s27, 4  ;;  %s116_s13 = sshll.u32 %s2501_s29, 4  ;;  %s91_s20 = int_to_ptr.vmem [resolvable:$true] %s90_s20  ;;  %s117_s13 = int_to_ptr.vmem [resolvable:$true] %s116_s13 }
  0x1f   :  { %96 = dma.hbm_to_vmem [thread:$0]  %s89_s18, 32, %s91_s20, [#allocation5], %s2496_s3, %s2496_s3, %s2497_s28  }
  0x20   :  { %s139_s0 = sshll.u32 %s3157_s19, 4  ;;  %s152_s1 = sshll.u32 %s3159_s21, 4  ;;  %s140_s0 = int_to_ptr.hbm [resolvable:$true] %s139_s0  ;;  %s153_s1 = int_to_ptr.hbm [resolvable:$true] %s152_s1 }
  0x21   :  { %122 = dma.hbm_to_vmem [thread:$0]  %s115_s26, 32, %s117_s13, [#allocation8], %s2496_s3, %s2496_s3, %s2497_s28  }
  0x22   :  { %s2502_s30 = smov [#allocation12]   ;;  %s2503_s16 = smov [#allocation13]  }
  0x23   :  { %s141_s17 = sshll.u32 %s2502_s30, 4  ;;  %s154_s5 = sshll.u32 %s2503_s16, 4  ;;  %s142_s17 = int_to_ptr.vmem [resolvable:$true] %s141_s17  ;;  %s155_s5 = int_to_ptr.vmem [resolvable:$true] %s154_s5 }
  0x24   :  { %144 = dma.hbm_to_vmem [thread:$0]  %s140_s0, 16, %s142_s17, [#allocation11]  }
  0x25   :  { %157 = dma.hbm_to_vmem [thread:$0]  %s153_s1, 16, %s155_s5, [#allocation14]  }
  0x26   :  { %2482 = dma.done.wait [#allocation3], 256  }
  0x27   :  { %2483 = vsyncadd [#allocation3], 4294967040 }
  0x28   :  { %2484 = dma.done.wait [#allocation5], 288  }
  0x29   :  { %2485 = vsyncadd [#allocation5], 4294967008 }
  0x2a   :  { %2486 = dma.done.wait [#allocation8], 64  }
  0x2b   :  { %2487 = vsyncadd [#allocation8], 4294967232 }
  0x2c   :  { %2488 = dma.done.wait [#allocation11], 32  }
  0x2d   :  { %2489 = vsyncadd [#allocation11], 4294967264 }
  0x2e   :  { %2490 = dma.done.wait [#allocation14], 16  }
  0x2f   :  { %2491 = vsyncadd [#allocation14], 4294967280  ;;  %v193_v0 = vld [vmem:[#allocation4 + $0x8] sm:$0xff]  ;;  %v192_v1 = vld [vmem:[#allocation4] sm:$0xff]  ;;  %s3180_s3 = sld [smem:[#allocation20_spill]]  ;;  %vm194_vm0 = vcmask 130048  }
  0x30   :  { %215 = vmatpush.msra.mxu0 %v193_v0  ;;  %2105 = vmatpush.msra.mxu1 %v193_v0  ;;  %v2504_v10 = vmov 16.0   ;;  %s3181_s2 = sld [smem:[#allocation21_spill]]  ;;  %v2505_v14 = vmov 0   ;;  %vm376_vm12 = vcmask 261120   ;;  %s2506_s25 = smov 96   ;;  %vm416_vm13 = vcmask 64512  }
  0x31   :  { %2196 = vrcp.f32 %v2504_v10  ;;  %2135 = vset.pattern.permute.xlu1 %v2505_v14  ;;  %2134 = vset.pattern.permute.xlu0 %v2505_v14  ;;  %s3182_s29 = sld [smem:[#allocation24_spill]]  ;;  %s2507_s18 = smov 64  }
  0x32   :  { %216 = vmatpush.msra.mxu0 %v192_v1  ;;  %2106 = vmatpush.msra.mxu1 %v192_v1  ;;  %s3183_s15 = sld [smem:[#allocation26_spill]]  ;;  %s2509_s6 = smov 120  }
  0x33   :  { %2133 = vset.pattern.permute.xlu2 %v2505_v14  ;;  %s2510_s26 = smov 80   ;;  %s2511_s27 = smov 72  }
  0x34   :  { %s2512_s20 = smov 104   ;;  %s2514_s4 = smov 56  }
  0x35   :  { %v2660_v2 = vld [vmem:[%s3180_s3] sm:$0xff]  ;;  %v2665_v3 = vld [vmem:[%s3180_s3 + $0x8] sm:$0xff]  ;;  %s3184_s3 = sld [smem:[#allocation25_spill]]  ;;  %s2515_s0 = smov 40  }
  0x36   :  { %1998 = vmatmul.msk.f32.vlgmr.msra.gmra.mxu0 %vm194_vm0, %v2660_v2  ;;  %1999 = vmatmul.msk.f32.vlgmr.msra.gmra.mxu1 %vm194_vm0, %v2665_v3  ;;  %v301_v13 = vld [vmem:[%s3181_s2] sm:$0xff]  ;;  %v302_v15 = vld [vmem:[%s3181_s2 + $0x8] sm:$0xff]  ;;  %s2508_s2 = smov 88   ;;  %s2516_s23 = smov 48  }
  0x37   :  { %v2197_v11 = vpop.eup %2196  ;;  %305 = vperm.xlu2 %2133, %v301_v13   ;;  %v315_v18 = vsub.f32 1.0, %v301_v13  ;;  %v316_v31 = vsub.f32 1.0, %v302_v15  ;;  %v332_v32 = vld [vmem:[%s3182_s29 + $0x8] sm:$0xff]  ;;  %v331_v33 = vld [vmem:[%s3182_s29] sm:$0xff]  ;;  %s2513_s29 = smov 112   ;;  %s3185_s17 = sld [smem:[#allocation27_spill]] }
  0x38   :  { %v233_v12 = vmul.f32 16.0, %v2197_v11  ;;  %vm237_vm1 = vweird.f32 %v2197_v11  ;;  %357 = vmatpush.msrb.mxu1 %v332_v32  ;;  %v371_v37 = vld [vmem:[%s3183_s15 + $0x18] sm:$0xff]  ;;  %v370_v38 = vld [vmem:[%s3183_s15 + $0x10] sm:$0xff]  ;;  %s3187_s28 = sld [smem:[#allocation29_spill]] }
  0x39   :  { %395 = vmatpush.msra.mxu2 %v371_v37 }
  0x3a   :  { %v234_v16 = vsub.f32 1.0, %v233_v12  ;;  %358 = vmatpush.msrb.mxu1 %v331_v33 }
  0x3b   :  { %396 = vmatpush.msra.mxu2 %v370_v38 }
  0x3c   :  { %v235_v17 = vmul.f32 %v2197_v11, %v234_v16  ;;  %v368_v16 = vld [vmem:[%s3183_s15] sm:$0xff] }
  0x3e   :  { %v236_v19 = vadd.f32 %v2197_v11, %v235_v17 }
  0x3f   :  { %319 = vperm.xlu2 %2133, %v315_v18  }
  0x40   :  { %v238_v20 = vsel %vm237_vm1, %v2197_v11, %v236_v19 }
  0x91   :  { %v306_v43 = vpop.permute.xlu2 %305 }
  0x99   :  { %v320_v53 = vpop.permute.xlu2 %319 }
  0x9a   :  { %v327_v60 = vmul.f32 %v320_v53, %v2660_v2 }
  0xb3   :  { %v2671_v4 = vpop.f32.mrf.mxu0  ;;  %v2675_v6 = vpop.f32.mrf.mxu1 }
  0xb4   :  { %v224_v5 = vsub.f32 %v2660_v2, %v2671_v4  ;;  %v225_v8 = vsub.f32 %v2665_v3, %v2675_v6 }
  0xb6   :  { %v226_v7 = vsel %vm194_vm0, %v224_v5, 0.0  ;;  %v229_v9 = vsel %vm194_vm0, %v225_v8, 0.0 }
  0xb7   :  { %227 = vadd.xlane.f32.xlu0 %v226_v7 }
  0xbf   :  { %230 = vadd.xlane.f32.xlu0 %v229_v9 }
  0xd3   :  { %310 = vperm.xlu0 %2134, %v302_v15   ;;  %v369_v15 = vld [vmem:[%s3183_s15 + $0x8] sm:$0xff] }
  0xd4   :  { %397 = vmatpush.msra.mxu2 %v369_v15 }
  0xd6   :  { %398 = vmatpush.msra.mxu2 %v368_v16 }
 0x12a   :  { %v228_v21 = vpop.xlane.xlu0 %227 }
 0x12b   :  { %v2687_v22 = vmul.f32 %v238_v20, %v228_v21 }
 0x12d   :  { %v241_v23 = vsub.f32 %v224_v5, %v2687_v22 }
 0x12f   :  { %v243_v24 = vmul.f32 %v241_v23, %v241_v23 }
 0x131   :  { %v245_v25 = vsel %vm194_vm0, %v243_v24, 0.0 }
 0x132   :  { %246 = vadd.xlane.f32.xlu1 %v245_v25  ;;  %v231_v26 = vpop.xlane.xlu0 %230 }
 0x133   :  { %v2691_v27 = vmul.f32 %v238_v20, %v231_v26 }
 0x135   :  { %v242_v28 = vsub.f32 %v225_v8, %v2691_v27 }
 0x137   :  { %v244_v29 = vmul.f32 %v242_v28, %v242_v28 }
 0x139   :  { %v248_v30 = vsel %vm194_vm0, %v244_v29, 0.0 }
 0x13a   :  { %249 = vadd.xlane.f32.xlu1 %v248_v30  ;;  %v2741_v30 = vld [vmem:[#allocation2] sm:$0xff] }
 0x145   :  { %v311_v7 = vpop.permute.xlu0 %310 }
 0x153   :  { %324 = vperm.xlu1 %2135, %v316_v31  }
 0x1a5   :  { %v247_v34 = vpop.xlane.xlu1 %246 }
 0x1a6   :  { %v251_v35 = vmul.f32 %v247_v34, %v238_v20  ;;  %v2745_v34 = vld [vmem:[#allocation2 + $0x8] sm:$0xff] }
 0x1a8   :  { %v253_v36 = vadd.f32 1e-05, %v251_v35 }
 0x1aa   :  { %2198 = vrsqrt.f32 %v253_v36  ;;  %vm261_vm3 = vweird.f32 %v253_v36  ;;  %vm282_vm5 = vcmp.eq.f32.partialorder %v253_v36, inf  ;;  %v285_v56 = vand.u32 2147483648, %v253_v36 }
 0x1ab   :  { %vm284_vm6 = vcmp.eq.f32.partialorder %v253_v36, 0.0 }
 0x1ad   :  { %v250_v39 = vpop.xlane.xlu1 %249 }
 0x1ae   :  { %v252_v40 = vmul.f32 %v250_v39, %v238_v20 }
 0x1b0   :  { %v2199_v41 = vpop.eup %2198  ;;  %v254_v42 = vadd.f32 1e-05, %v252_v40 }
 0x1b1   :  { %v256_v44 = vmul.f32 %v2199_v41, %v253_v36  ;;  %vm262_vm2 = vweird.f32 %v2199_v41 }
 0x1b2   :  { %2200 = vrsqrt.f32 %v254_v42  ;;  %vm263_vm4 = vmor %vm261_vm3, %vm262_vm2  ;;  %vm271_vm8 = vweird.f32 %v254_v42  ;;  %vm294_vm10 = vcmp.eq.f32.partialorder %v254_v42, inf  ;;  %v297_v9 = vand.u32 2147483648, %v254_v42 }
 0x1b3   :  { %v257_v45 = vmul.f32 %v2199_v41, %v256_v44  ;;  %vm296_vm11 = vcmp.eq.f32.partialorder %v254_v42, 0.0 }
 0x1b5   :  { %v258_v46 = vmul.f32 0.5, %v257_v45 }
 0x1b7   :  { %v259_v47 = vsub.f32 1.5, %v258_v46 }
 0x1b8   :  { %v2201_v48 = vpop.eup %2200 }
 0x1b9   :  { %v260_v49 = vmul.f32 %v2199_v41, %v259_v47  ;;  %v266_v50 = vmul.f32 %v2201_v48, %v254_v42  ;;  %vm272_vm7 = vweird.f32 %v2201_v48 }
 0x1ba   :  { %vm273_vm9 = vmor %vm271_vm8, %vm272_vm7 }
 0x1bb   :  { %v264_v51 = vsel %vm263_vm4, %v2199_v41, %v260_v49  ;;  %v281_v52 = vmul.f32 %v260_v49, %v253_v36  ;;  %v267_v54 = vmul.f32 %v2201_v48, %v266_v50 }
 0x1bc   :  { %v299_v55 = vmul.f32 %v264_v51, %v241_v23  ;;  %v2177_v23 = vld [vmem:[%s3145_s7] ss:$0 sm:$0xff] }
 0x1bd   :  { %v268_v57 = vmul.f32 0.5, %v267_v54  ;;  %v283_v58 = vsel %vm282_vm5, %v253_v36, %v281_v52  ;;  %v406_v52 = vld [vmem:[%s3146_s8] sm:$0xff] }
 0x1be   :  { %v313_v59 = vmul.f32 %v306_v43, %v299_v55  ;;  %v2708_v61 = vsel %vm284_vm6, %v285_v56, %v283_v58  ;;  %vm1035_vm6 = vcmask 523264  }
 0x1bf   :  { %v269_v62 = vsub.f32 1.5, %v268_v57 }
 0x1c0   :  { %v329_v63 = vadd.f32 %v327_v60, %v313_v59 }
 0x1c1   :  { %v270_v0 = vmul.f32 %v2201_v48, %v269_v62 }
 0x1c2   :  { %2000 = vmatmul.msk.f32.vlgmr.msrb.gmra.mxu1 %vm194_vm0, %v329_v63 }
 0x1c3   :  { %v274_v1 = vsel %vm273_vm9, %v2201_v48, %v270_v0  ;;  %v293_v5 = vmul.f32 %v270_v0, %v254_v42 }
 0x1c4   :  { %v300_v8 = vmul.f32 %v274_v1, %v242_v28 }
 0x1c5   :  { %v325_v10 = vpop.permute.xlu1 %324  ;;  %v295_v11 = vsel %vm294_vm10, %v254_v42, %v293_v5 }
 0x1c6   :  { %v328_v2 = vmul.f32 %v325_v10, %v2665_v3  ;;  %v314_v12 = vmul.f32 %v311_v7, %v300_v8  ;;  %v2712_v13 = vsel %vm296_vm11, %v297_v9, %v295_v11  ;;  %v2176_v3 = vld [vmem:[%s3184_s3] ss:$0 sm:$0xff] }
 0x1c8   :  { %v330_v14 = vadd.f32 %v328_v2, %v314_v12 }
 0x1ca   :  { %2001 = vmatmul.msk.f32.gmra.mxu1 %vm194_vm0, %v330_v14 }
 0x23f   :  { %v360_v17 = vpop.f32.mrf.mxu1 }
 0x240   :  { %v2724_v18 = vadd.f32 %v2176_v3, %v360_v17 }
 0x242   :  { %2002 = vmatmul.msk.f32.vlgmr.msra.gmra.mxu2 %vm376_vm12, %v2724_v18 }
 0x247   :  { %v363_v19 = vpop.f32.mrf.mxu1 }
 0x248   :  { %v2728_v20 = vadd.f32 %v2176_v3, %v363_v19 }
 0x24a   :  { %2003 = vmatmul.msk.f32.gmra.mxu2 %vm376_vm12, %v2728_v20 }
 0x2c5   :  { %v400_v21 = vpop.f32.mrf.mxu2 }
 0x2c6   :  { %v401_v26 = vadd.f32 %v2177_v23, %v400_v21 }
 0x2cd   :  { %v403_v24 = vpop.f32.mrf.mxu2 }
 0x2ce   :  { %v404_v25 = vadd.f32 %v2177_v23, %v403_v24 }
 0x2d0   :  { %414 = vrot.lane.b32.xlu2 %v404_v25, %s2506_s25  ;;  %v2749_v38 = vpack.i.bf16 %v401_v26, %v404_v25 }
 0x2d8   :  { %412 = vrot.lane.b32.xlu2 %v401_v26, %s2506_s25 }
 0x32a   :  { %v415_v28 = vpop.permute.xlu2 %414 }
 0x32b   :  { %2004 = vmatpush.xpose.msk.msra.mxu3 %vm416_vm13, %v415_v28 }
 0x332   :  { %v413_v29 = vpop.permute.xlu2 %412 }
 0x333   :  { %2005 = vmatpush.xpose.msk.msra.mxu3 %vm416_vm13, %v413_v29 }
 0x336   :  { %2006 = vmatmul.msk.f32.vlgmr.msra.gmra.mxu3 %vm416_vm13, %v401_v26 }
 0x33e   :  { %2007 = vmatmul.msk.f32.gmra.mxu3 %vm416_vm13, %v404_v25 }
 0x3b9   :  { %v442_v31 = vpop.f32.mrf.mxu3 }
 0x3ba   :  { %v443_v32 = vadd.f32 %v442_v31, %v2741_v30 }
 0x3bc   :  { %v448_v33 = vsel %vm194_vm0, %v443_v32, -inf }
 0x3bd   :  { %449 = vmax.xlane.f32.xlu2 %v448_v33 }
 0x3c1   :  { %v445_v35 = vpop.f32.mrf.mxu3 }
 0x3c2   :  { %v446_v36 = vadd.f32 %v445_v35, %v2745_v34 }
 0x3c4   :  { %v451_v37 = vsel %vm194_vm0, %v446_v36, -inf }
 0x3c5   :  { %452 = vmax.xlane.f32.xlu1 %v451_v37 }
 0x3d5   :  { %2137 = vrot.lane.b32.xlu2 %v2749_v38, %s2507_s18 }
 0x3dd   :  { %509 = vrot.lane.b32.xlu2 %v401_v26, %s2508_s2 }
 0x3e5   :  { %507 = vrot.lane.b32.xlu2 %v404_v25, %s2509_s6 }
 0x3ed   :  { %665 = vrot.lane.b32.xlu2 %v404_v25, %s2510_s26 }
 0x3f5   :  { %792 = vrot.lane.b32.xlu2 %v404_v25, %s2511_s27 }
 0x3fd   :  { %786 = vrot.lane.b32.xlu2 %v401_v26, %s2512_s20 }
 0x430   :  { %v450_v39 = vpop.xlane.xlu2 %449 }
 0x431   :  { %v454_v40 = vsub.f32 %v443_v32, %v450_v39 }
 0x433   :  { %v456_v41 = vmul.f32 1.442695, %v454_v40 }
 0x435   :  { %2202 = vpow2.f32 %v456_v41 }
 0x438   :  { %v453_v42 = vpop.xlane.xlu1 %452  ;;  %v2138_v43 = vpop.permute.xlu2 %2137 }
 0x439   :  { %v455_v44 = vsub.f32 %v446_v36, %v453_v42  ;;  %v2139_v45 = vunpack.i.l.bf16 %v2138_v43  ;;  %v2140_v48 = vunpack.i.h.bf16 %v2138_v43 }
 0x43b   :  { %v2203_v46 = vpop.eup %2202  ;;  %v458_v47 = vmul.f32 1.442695, %v455_v44  ;;  %496 = vmatpush.msrb.mxu0 %v2139_v45 }
 0x43c   :  { %v460_v49 = vsel %vm194_vm0, %v2203_v46, 0.0 }
 0x43d   :  { %2204 = vpow2.f32 %v458_v47  ;;  %461 = vadd.xlane.f32.xlu0 %v460_v49  ;;  %497 = vmatpush.msrb.mxu0 %v2140_v48 }
 0x43f   :  { %651 = vmatpush.msra.mxu0 %v406_v52 }
 0x440   :  { %v510_v53 = vpop.permute.xlu2 %509 }
 0x443   :  { %v2205_v50 = vpop.eup %2204 }
 0x444   :  { %v463_v51 = vsel %vm194_vm0, %v2205_v50, 0.0 }
 0x445   :  { %464 = vadd.xlane.f32.xlu1 %v463_v51 }
 0x448   :  { %v508_v54 = vpop.permute.xlu2 %507 }
 0x450   :  { %v666_v55 = vpop.permute.xlu2 %665 }
 0x451   :  { %505 = vrot.lane.b32.xlu0 %v401_v26, %s2509_s6 }
 0x458   :  { %v793_v60 = vpop.permute.xlu2 %792 }
 0x459   :  { %659 = vrot.lane.b32.xlu0 %v401_v26, %s2513_s29 }
 0x45e   :  { %511 = vrot.lane.b32.xlu1 %v404_v25, %s2508_s2 }
 0x460   :  { %v787_v2 = vpop.permute.xlu2 %786 }
 0x461   :  { %661 = vrot.lane.b32.xlu0 %v404_v25, %s2513_s29 }
 0x466   :  { %663 = vrot.lane.b32.xlu1 %v401_v26, %s2510_s26 }
 0x46e   :  { %790 = vrot.lane.b32.xlu1 %v401_v26, %s2511_s27 }
 0x476   :  { %788 = vrot.lane.b32.xlu1 %v404_v25, %s2512_s20 }
 0x4b0   :  { %v462_v56 = vpop.xlane.xlu0 %461 }
 0x4b1   :  { %2206 = vrcp.f32 %v462_v56 }
 0x4b7   :  { %v2207_v57 = vpop.eup %2206 }
 0x4b8   :  { %v465_v58 = vpop.xlane.xlu1 %464  ;;  %v468_v59 = vmul.f32 %v2207_v57, %v2203_v46 }
 0x4b9   :  { %2208 = vrcp.f32 %v465_v58 }
 0x4ba   :  { %2008 = vmatmul.msk.f32.vlgmr.msrb.gmra.mxu0 %vm194_vm0, %v468_v59 }
 0x4bb   :  { %2028 = vmatpush.xpose.msk.msrb.mxu0 %vm416_vm13, %v793_v60 }
 0x4bf   :  { %v2209_v62 = vpop.eup %2208 }
 0x4c0   :  { %v469_v63 = vmul.f32 %v2209_v62, %v2205_v50 }
 0x4c2   :  { %2009 = vmatmul.msk.f32.gmra.mxu0 %vm194_vm0, %v469_v63 }
 0x4c3   :  { %v506_v1 = vpop.permute.xlu0 %505 }
 0x4cb   :  { %v660_v8 = vpop.permute.xlu0 %659 }
 0x4d0   :  { %v512_v0 = vpop.permute.xlu1 %511 }
 0x4d1   :  { %2010 = vmatpush.xpose.msk.msra.mxu1 %vm416_vm13, %v512_v0 }
 0x4d3   :  { %v662_v9 = vpop.permute.xlu0 %661 }
 0x4d5   :  { %2011 = vmatpush.xpose.msk.msra.mxu1 %vm416_vm13, %v510_v53 }
 0x4d8   :  { %v664_v5 = vpop.permute.xlu1 %663  ;;  %2012 = vmatmul.msk.f32.vlgmr.msra.gmra.mxu1 %vm416_vm13, %v506_v1 }
 0x4d9   :  { %2020 = vmatpush.xpose.msk.msrb.mxu1 %vm416_vm13, %v666_v55 }
 0x4dd   :  { %2021 = vmatpush.xpose.msk.msrb.mxu1 %vm416_vm13, %v664_v5 }
 0x4e0   :  { %v791_v7 = vpop.permute.xlu1 %790  ;;  %2013 = vmatmul.msk.f32.gmra.mxu1 %vm416_vm13, %v508_v54 }
 0x4e1   :  { %2029 = vmatpush.xpose.msk.msrb.mxu0 %vm416_vm13, %v791_v7 }
 0x4e8   :  { %2022 = vmatmul.msk.f32.vlgmr.msrb.gmra.mxu1 %vm416_vm13, %v660_v8  ;;  %v789_v12 = vpop.permute.xlu1 %788 }
 0x4f0   :  { %2023 = vmatmul.msk.f32.gmra.mxu1 %vm416_vm13, %v662_v9 }
 0x537   :  { %v499_v10 = vpop.f32.mrf.mxu0 }
 0x538   :  { %2018 = vmatmul.msk.f32.vlgmr.msra.gmra.mxu0 %vm416_vm13, %v499_v10 }
 0x53f   :  { %v502_v11 = vpop.f32.mrf.mxu0 }
 0x540   :  { %2019 = vmatmul.msk.f32.gmra.mxu0 %vm416_vm13, %v502_v11 }
 0x548   :  { %2030 = vmatmul.msk.f32.vlgmr.msrb.gmra.mxu0 %vm416_vm13, %v787_v2 }
 0x550   :  { %2031 = vmatmul.msk.f32.gmra.mxu0 %vm416_vm13, %v789_v12 }
 0x555   :  { %v538_v14 = vpop.f32.mrf.mxu1 }
 0x556   :  { %v539_v15 = vadd.f32 %v538_v14, %v2741_v30 }
 0x558   :  { %v544_v16 = vsel %vm194_vm0, %v539_v15, -inf }
 0x559   :  { %545 = vmax.xlane.f32.xlu0 %v544_v16 }
 0x55d   :  { %v541_v3 = vpop.f32.mrf.mxu1 }
 0x55e   :  { %v542_v17 = vadd.f32 %v541_v3, %v2745_v34 }
 0x560   :  { %v547_v19 = vsel %vm194_vm0, %v542_v17, -inf }
 0x561   :  { %548 = vmax.xlane.f32.xlu2 %v547_v19 }
 0x565   :  { %v692_v21 = vpop.f32.mrf.mxu1 }
 0x566   :  { %v693_v23 = vadd.f32 %v692_v21, %v2741_v30 }
 0x568   :  { %v698_v24 = vsel %vm194_vm0, %v693_v23, -inf }
 0x569   :  { %699 = vmax.xlane.f32.xlu1 %v698_v24 }
 0x56d   :  { %v695_v25 = vpop.f32.mrf.mxu1 }
 0x56e   :  { %v696_v26 = vadd.f32 %v695_v25, %v2745_v34 }
 0x570   :  { %v701_v28 = vsel %vm194_vm0, %v696_v26, -inf }
 0x571   :  { %702 = vmax.xlane.f32.xlu0 %v701_v28 }
 0x5b5   :  { %v2794_v29 = vpop.f32.mrf.mxu0 }
 0x5bd   :  { %v2796_v31 = vpop.f32.mrf.mxu0 }
 0x5c5   :  { %v819_v32 = vpop.f32.mrf.mxu0 }
 0x5c6   :  { %v820_v33 = vadd.f32 %v819_v32, %v2741_v30 }
 0x5c8   :  { %v825_v35 = vsel %vm194_vm0, %v820_v33, -inf }
 0x5c9   :  { %826 = vmax.xlane.f32.xlu2 %v825_v35 }
 0x5cc   :  { %v546_v36 = vpop.xlane.xlu0 %545 }
 0x5cd   :  { %v550_v37 = vsub.f32 %v539_v15, %v546_v36  ;;  %v822_v39 = vpop.f32.mrf.mxu0 }
 0x5ce   :  { %v823_v40 = vadd.f32 %v822_v39, %v2745_v34  ;;  %v407_v39 = vld [vmem:[%s3146_s8 + $0x8] sm:$0xff] }
 0x5cf   :  { %v552_v41 = vmul.f32 1.442695, %v550_v37  ;;  %622 = vmatpush.msrb.mxu3 %v407_v39 }
 0x5d0   :  { %v828_v42 = vsel %vm194_vm0, %v823_v40, -inf }
 0x5d1   :  { %2210 = vpow2.f32 %v552_v41  ;;  %829 = vmax.xlane.f32.xlu1 %v828_v42 }
 0x5d4   :  { %v549_v43 = vpop.xlane.xlu2 %548 }
 0x5d5   :  { %v551_v44 = vsub.f32 %v542_v17, %v549_v43 }
 0x5d7   :  { %v2211_v45 = vpop.eup %2210  ;;  %v554_v46 = vmul.f32 1.442695, %v551_v44 }
 0x5d8   :  { %v556_v47 = vsel %vm194_vm0, %v2211_v45, 0.0 }
 0x5d9   :  { %2212 = vpow2.f32 %v554_v46  ;;  %557 = vadd.xlane.f32.xlu0 %v556_v47  ;;  %v408_v46 = vld [vmem:[%s3146_s8 + $0x10] sm:$0xff] }
 0x5da   :  { %776 = vmatpush.msra.mxu3 %v408_v46  ;;  %v1027_v46 = vld [vmem:[%s3152_s14 + $0x20] sm:$0xff] }
 0x5dc   :  { %v700_v48 = vpop.xlane.xlu1 %699 }
 0x5dd   :  { %v704_v49 = vsub.f32 %v693_v23, %v700_v48  ;;  %v409_v48 = vld [vmem:[%s3146_s8 + $0x18] sm:$0xff] }
 0x5df   :  { %v2213_v50 = vpop.eup %2212  ;;  %v706_v51 = vmul.f32 1.442695, %v704_v49 }
 0x5e0   :  { %v559_v52 = vsel %vm194_vm0, %v2213_v50, 0.0 }
 0x5e1   :  { %2214 = vpow2.f32 %v706_v51  ;;  %560 = vadd.xlane.f32.xlu1 %v559_v52  ;;  %2142 = vrot.lane.b32.xlu2 %v2749_v38, %s2514_s4 }
 0x5e4   :  { %v703_v53 = vpop.xlane.xlu0 %702 }
 0x5e5   :  { %v705_v54 = vsub.f32 %v696_v26, %v703_v53 }
 0x5e7   :  { %v2215_v55 = vpop.eup %2214  ;;  %v708_v56 = vmul.f32 1.442695, %v705_v54 }
 0x5e8   :  { %v710_v57 = vsel %vm194_vm0, %v2215_v55, 0.0 }
 0x5e9   :  { %2216 = vpow2.f32 %v708_v56  ;;  %711 = vadd.xlane.f32.xlu0 %v710_v57  ;;  %2152 = vrot.lane.b32.xlu2 %v2749_v38, %s2515_s0 }
 0x5ef   :  { %v2217_v58 = vpop.eup %2216 }
 0x5f0   :  { %v713_v59 = vsel %vm194_vm0, %v2217_v58, 0.0 }
 0x5f1   :  { %714 = vadd.xlane.f32.xlu0 %v713_v59  ;;  %v2178_v59 = vld [vmem:[%s3147_s9] ss:$0 sm:$0xff] }
 0x5fa   :  { %2147 = vrot.lane.b32.xlu1 %v2749_v38, %s2516_s23 }
 0x63c   :  { %v827_v60 = vpop.xlane.xlu2 %826 }
 0x63d   :  { %v831_v62 = vsub.f32 %v820_v33, %v827_v60 }
 0x63f   :  { %v833_v63 = vmul.f32 1.442695, %v831_v62 }
 0x641   :  { %2218 = vpow2.f32 %v833_v63 }
 0x644   :  { %v830_v0 = vpop.xlane.xlu1 %829  ;;  %v2143_v1 = vpop.permute.xlu2 %2142 }
 0x645   :  { %v832_v5 = vsub.f32 %v823_v40, %v830_v0  ;;  %v2144_v7 = vunpack.i.l.bf16 %v2143_v1  ;;  %v2145_v10 = vunpack.i.h.bf16 %v2143_v1 }
 0x647   :  { %v2219_v8 = vpop.eup %2218  ;;  %v835_v9 = vmul.f32 1.442695, %v832_v5  ;;  %592 = vmatpush.msrb.mxu2 %v2144_v7 }
 0x648   :  { %v837_v11 = vsel %vm194_vm0, %v2219_v8, 0.0 }
 0x649   :  { %2220 = vpow2.f32 %v835_v9  ;;  %838 = vadd.xlane.f32.xlu0 %v837_v11  ;;  %593 = vmatpush.msrb.mxu2 %v2145_v10 }
 0x64c   :  { %v558_v2 = vpop.xlane.xlu0 %557  ;;  %v2153_v12 = vpop.permute.xlu2 %2152 }
 0x64d   :  { %2222 = vrcp.f32 %v558_v2  ;;  %v2154_v38 = vunpack.i.l.bf16 %v2153_v12  ;;  %v2155_v15 = vunpack.i.h.bf16 %v2153_v12  ;;  %v2517_v12 = vmov 32.0  }
 0x64f   :  { %v2221_v14 = vpop.eup %2220  ;;  %873 = vmatpush.msra.mxu1 %v2154_v38 }
 0x650   :  { %v840_v16 = vsel %vm194_vm0, %v2221_v14, 0.0 }
 0x651   :  { %841 = vadd.xlane.f32.xlu0 %v840_v16  ;;  %874 = vmatpush.msra.mxu1 %v2155_v15 }
 0x653   :  { %v2223_v3 = vpop.eup %2222 }
 0x654   :  { %v561_v17 = vpop.xlane.xlu1 %560  ;;  %v564_v19 = vmul.f32 %v2223_v3, %v2211_v45 }
 0x655   :  { %2224 = vrcp.f32 %v561_v17 }
 0x656   :  { %2014 = vmatmul.msk.f32.vlgmr.msrb.gmra.mxu2 %vm194_vm0, %v564_v19 }
 0x65b   :  { %v2225_v21 = vpop.eup %2224 }
 0x65c   :  { %v565_v23 = vmul.f32 %v2225_v21, %v2213_v50  ;;  %v712_v24 = vpop.xlane.xlu0 %711 }
 0x65d   :  { %2226 = vrcp.f32 %v712_v24 }
 0x65e   :  { %2015 = vmatmul.msk.f32.gmra.mxu2 %vm194_vm0, %v565_v23 }
 0x663   :  { %v2227_v28 = vpop.eup %2226 }
 0x664   :  { %v715_v25 = vpop.xlane.xlu0 %714  ;;  %v718_v35 = vmul.f32 %v2227_v28, %v2215_v55 }
 0x665   :  { %2228 = vrcp.f32 %v715_v25 }
 0x66b   :  { %v2229_v36 = vpop.eup %2228 }
 0x66c   :  { %v2148_v26 = vpop.permute.xlu1 %2147  ;;  %v719_v37 = vmul.f32 %v2229_v36, %v2217_v58  ;;  %v984_v36 = vld [vmem:[%s3150_s12] sm:$0xff] }
 0x66d   :  { %v2149_v32 = vunpack.i.l.bf16 %v2148_v26  ;;  %v2150_v33 = vunpack.i.h.bf16 %v2148_v26 }
 0x66f   :  { %746 = vmatpush.msra.mxu2 %v2149_v32  ;;  %v987_v32 = vld [vmem:[%s3150_s12 + $0x18] sm:$0xff] }
 0x671   :  { %747 = vmatpush.msra.mxu2 %v2150_v33  ;;  %v986_v33 = vld [vmem:[%s3150_s12 + $0x10] sm:$0xff] }
 0x672   :  { %2024 = vmatmul.msk.f32.vlgmr.msra.gmra.mxu2 %vm194_vm0, %v718_v35  ;;  %v985_v35 = vld [vmem:[%s3150_s12 + $0x8] sm:$0xff] }
 0x673   :  { %903 = vmatpush.msrb.mxu2 %v409_v48 }
 0x67a   :  { %2025 = vmatmul.msk.f32.gmra.mxu2 %vm194_vm0, %v719_v37 }
 0x6bc   :  { %v839_v40 = vpop.xlane.xlu0 %838 }
 0x6bd   :  { %2230 = vrcp.f32 %v839_v40 }
 0x6c3   :  { %v2231_v41 = vpop.eup %2230 }
 0x6c4   :  { %v845_v42 = vmul.f32 %v2231_v41, %v2219_v8  ;;  %v842_v43 = vpop.xlane.xlu0 %841  ;;  %v1030_v41 = vld [vmem:[%s3152_s14 + $0x38] sm:$0xff] }
 0x6c5   :  { %2232 = vrcp.f32 %v842_v43  ;;  %1050 = vmatpush.msra.mxu0 %v1030_v41  ;;  %v1028_v43 = vld [vmem:[%s3152_s14 + $0x28] sm:$0xff] }
 0x6c6   :  { %2032 = vmatmul.msk.f32.vlgmr.msra.gmra.mxu1 %vm194_vm0, %v845_v42  ;;  %2234 = vrcp.f32 %v2517_v12  ;;  %v1029_v42 = vld [vmem:[%s3152_s14 + $0x30] sm:$0xff]  ;;  %v1023_v12 = vld [vmem:[%s3152_s14] sm:$0xff] }
 0x6c7   :  { %1051 = vmatpush.msra.mxu0 %v1029_v42 }
 0x6c9   :  { %1052 = vmatpush.msra.mxu0 %v1028_v43 }
 0x6cb   :  { %v2233_v44 = vpop.eup %2232  ;;  %1053 = vmatpush.msra.mxu0 %v1027_v46  ;;  %v2042_v46 = vld [vmem:[%s3183_s15 + $0x30] sm:$0xff] }
 0x6cc   :  { %v846_v45 = vmul.f32 %v2233_v44, %v2221_v14  ;;  %v2235_v38 = vpop.eup %2234 }
 0x6cd   :  { %v930_v14 = vmul.f32 32.0, %v2235_v38  ;;  %vm934_vm14 = vweird.f32 %v2235_v38 }
 0x6ce   :  { %2033 = vmatmul.msk.f32.gmra.mxu1 %vm194_vm0, %v846_v45 }
 0x6cf   :  { %v931_v15 = vsub.f32 1.0, %v930_v14 }
 0x6d9   :  { %v595_v47 = vpop.f32.mrf.mxu2 }
 0x6da   :  { %2016 = vmatmul.msk.f32.vlgmr.msrb.gmra.mxu3 %vm416_vm13, %v595_v47 }
 0x6db   :  { %1010 = vmatpush.msrb.mxu3 %v987_v32 }
 0x6dd   :  { %1011 = vmatpush.msrb.mxu3 %v986_v33 }
 0x6df   :  { %1012 = vmatpush.msrb.mxu3 %v985_v35 }
 0x6e1   :  { %v598_v49 = vpop.f32.mrf.mxu2  ;;  %1013 = vmatpush.msrb.mxu3 %v984_v36 }
 0x6e2   :  { %2017 = vmatmul.msk.f32.gmra.mxu3 %vm416_vm13, %v598_v49  ;;  %v1026_v49 = vld [vmem:[%s3152_s14 + $0x18] sm:$0xff] }
 0x6e3   :  { %1054 = vmatpush.msra.mxu0 %v1026_v49 }
 0x6f5   :  { %v749_v50 = vpop.f32.mrf.mxu2 }
 0x6f6   :  { %2026 = vmatmul.msk.f32.vlgmr.msra.gmra.mxu3 %vm416_vm13, %v749_v50 }
 0x6fd   :  { %v752_v51 = vpop.f32.mrf.mxu2 }
 0x6fe   :  { %2027 = vmatmul.msk.f32.gmra.mxu3 %vm416_vm13, %v752_v51 }
 0x743   :  { %v876_v52 = vpop.f32.mrf.mxu1 }
 0x744   :  { %2034 = vmatmul.msk.f32.vlgmr.msrb.gmra.mxu2 %vm416_vm13, %v876_v52 }
 0x74b   :  { %v879_v53 = vpop.f32.mrf.mxu1 }
 0x74c   :  { %2035 = vmatmul.msk.f32.gmra.mxu2 %vm416_vm13, %v879_v53 }
 0x75d   :  { %v624_v54 = vpop.f32.mrf.mxu3 }
 0x75e   :  { %v654_v57 = vadd.f32 %v2794_v29, %v624_v54 }
 0x765   :  { %v627_v55 = vpop.f32.mrf.mxu3 }
 0x766   :  { %v657_v1 = vadd.f32 %v2796_v31, %v627_v55  ;;  %v932_v31 = vmul.f32 %v2235_v38, %v931_v15 }
 0x768   :  { %v933_v16 = vadd.f32 %v2235_v38, %v932_v31 }
 0x779   :  { %v778_v56 = vpop.f32.mrf.mxu3 }
 0x77a   :  { %v784_v58 = vadd.f32 %v778_v56, %v654_v57  ;;  %v2179_v57 = vld [vmem:[%s3148_s10] ss:$0 sm:$0xff] }
 0x781   :  { %v781_v0 = vpop.f32.mrf.mxu3 }
 0x782   :  { %v785_v7 = vadd.f32 %v781_v0, %v657_v1 }
 0x7c7   :  { %v905_v60 = vpop.f32.mrf.mxu2 }
 0x7c8   :  { %v911_v62 = vadd.f32 %v905_v60, %v784_v58 }
 0x7ca   :  { %v917_v63 = vadd.f32 %v2178_v59, %v911_v62  ;;  %v2180_v62 = vld [vmem:[%s3149_s11] ss:$0 sm:$0xff] }
 0x7cc   :  { %v919_v5 = vadd.f32 %v917_v63, %v2724_v18  ;;  %v2844_v18 = vsel %vm934_vm14, %v2235_v38, %v933_v16  ;;  %v2181_v38 = vld [vmem:[%s3185_s17] ss:$0 sm:$0xff] }
 0x7ce   :  { %v923_v8 = vsel %vm376_vm12, %v919_v5, 0.0 }
 0x7cf   :  { %v908_v9 = vpop.f32.mrf.mxu2  ;;  %924 = vadd.xlane.f32.xlu2 %v923_v8 }
 0x7d0   :  { %v912_v10 = vadd.f32 %v908_v9, %v785_v7 }
 0x7d2   :  { %v918_v29 = vadd.f32 %v2178_v59, %v912_v10 }
 0x7d4   :  { %v920_v11 = vadd.f32 %v918_v29, %v2728_v20 }
 0x7d6   :  { %v926_v2 = vsel %vm376_vm12, %v920_v11, 0.0 }
 0x7d7   :  { %927 = vadd.xlane.f32.xlu1 %v926_v2  ;;  %v1024_v2 = vld [vmem:[%s3152_s14 + $0x8] sm:$0xff] }
 0x842   :  { %v925_v3 = vpop.xlane.xlu2 %924 }
 0x843   :  { %v936_v17 = vmul.f32 %v2844_v18, %v925_v3 }
 0x845   :  { %v938_v19 = vsub.f32 %v919_v5, %v936_v17 }
 0x847   :  { %v940_v21 = vmul.f32 %v938_v19, %v938_v19 }
 0x849   :  { %v942_v20 = vsel %vm376_vm12, %v940_v21, 0.0 }
 0x84a   :  { %943 = vadd.xlane.f32.xlu0 %v942_v20  ;;  %v928_v23 = vpop.xlane.xlu1 %927 }
 0x84b   :  { %v937_v24 = vmul.f32 %v2844_v18, %v928_v23 }
 0x84d   :  { %v939_v25 = vsub.f32 %v920_v11, %v937_v24  ;;  %v1025_v11 = vld [vmem:[%s3152_s14 + $0x10] sm:$0xff] }
 0x84e   :  { %1055 = vmatpush.msra.mxu0 %v1025_v11 }
 0x84f   :  { %v941_v26 = vmul.f32 %v939_v25, %v939_v25 }
 0x850   :  { %1056 = vmatpush.msra.mxu0 %v1024_v2 }
 0x851   :  { %v945_v28 = vsel %vm376_vm12, %v941_v26, 0.0 }
 0x852   :  { %946 = vadd.xlane.f32.xlu0 %v945_v28  ;;  %1057 = vmatpush.msra.mxu0 %v1023_v12 }
 0x8bd   :  { %v944_v37 = vpop.xlane.xlu0 %943 }
 0x8be   :  { %v948_v39 = vmul.f32 %v944_v37, %v2844_v18 }
 0x8c0   :  { %v950_v40 = vadd.f32 1e-05, %v948_v39 }
 0x8c2   :  { %2236 = vrsqrt.f32 %v950_v40  ;;  %vm958_vm1 = vweird.f32 %v950_v40 }
 0x8c5   :  { %v947_v44 = vpop.xlane.xlu0 %946 }
 0x8c6   :  { %v949_v45 = vmul.f32 %v947_v44, %v2844_v18 }
 0x8c8   :  { %v2237_v47 = vpop.eup %2236  ;;  %v951_v48 = vadd.f32 1e-05, %v949_v45  ;;  %v2043_v45 = vld [vmem:[%s3183_s15 + $0x38] sm:$0xff] }
 0x8c9   :  { %v953_v50 = vmul.f32 %v2237_v47, %v950_v40  ;;  %vm959_vm15 = vweird.f32 %v2237_v47  ;;  %1151 = vmatpush.msrb.mxu1 %v2043_v45 }
 0x8ca   :  { %2238 = vrsqrt.f32 %v951_v48  ;;  %vm960_vm2 = vmor %vm958_vm1, %vm959_vm15  ;;  %vm968_vm4 = vweird.f32 %v951_v48 }
 0x8cb   :  { %v954_v51 = vmul.f32 %v2237_v47, %v953_v50  ;;  %1152 = vmatpush.msrb.mxu1 %v2042_v46 }
 0x8cd   :  { %v955_v52 = vmul.f32 0.5, %v954_v51 }
 0x8cf   :  { %v956_v53 = vsub.f32 1.5, %v955_v52 }
 0x8d0   :  { %v2239_v54 = vpop.eup %2238 }
 0x8d1   :  { %v957_v55 = vmul.f32 %v2237_v47, %v956_v53  ;;  %v963_v56 = vmul.f32 %v2239_v54, %v951_v48  ;;  %vm969_vm3 = vweird.f32 %v2239_v54  ;;  %v2040_v48 = vld [vmem:[%s3183_s15 + $0x20] sm:$0xff] }
 0x8d2   :  { %vm970_vm5 = vmor %vm968_vm4, %vm969_vm3 }
 0x8d3   :  { %v961_v58 = vsel %vm960_vm2, %v2237_v47, %v957_v55  ;;  %v964_v59 = vmul.f32 %v2239_v54, %v963_v56  ;;  %v2041_v47 = vld [vmem:[%s3183_s15 + $0x28] sm:$0xff] }
 0x8d4   :  { %v972_v60 = vmul.f32 %v961_v58, %v938_v19  ;;  %v2182_v19 = vld [vmem:[#allocation6] ss:$0 sm:$0xff]  ;;  %1153 = vmatpush.msrb.mxu1 %v2041_v47 }
 0x8d5   :  { %v965_v63 = vmul.f32 0.5, %v964_v59 }
 0x8d6   :  { %v977_v0 = vmul.f32 %v2179_v57, %v972_v60  ;;  %1154 = vmatpush.msrb.mxu1 %v2040_v48 }
 0x8d7   :  { %v966_v1 = vsub.f32 1.5, %v965_v63 }
 0x8d8   :  { %v982_v5 = vadd.f32 %v2180_v62, %v977_v0  ;;  %v2183_v0 = vld [vmem:[#allocation7] ss:$0 sm:$0xff] }
 0x8d9   :  { %v967_v7 = vmul.f32 %v2239_v54, %v966_v1 }
 0x8da   :  { %2036 = vmatmul.msk.f32.vlgmr.msrb.gmra.mxu3 %vm376_vm12, %v982_v5 }
 0x8db   :  { %v971_v8 = vsel %vm970_vm5, %v2239_v54, %v967_v7 }
 0x8dc   :  { %v973_v9 = vmul.f32 %v971_v8, %v939_v25  ;;  %v2184_v8 = vld [vmem:[#allocation9] ss:$0 sm:$0xff] }
 0x8de   :  { %v978_v10 = vmul.f32 %v2179_v57, %v973_v9 }
 0x8e0   :  { %v983_v29 = vadd.f32 %v2180_v62, %v978_v10 }
 0x8e2   :  { %2037 = vmatmul.msk.f32.gmra.mxu3 %vm376_vm12, %v983_v29 }
 0x95d   :  { %v1015_v14 = vpop.f32.mrf.mxu3 }
 0x95e   :  { %v1016_v15 = vadd.f32 %v2181_v38, %v1015_v14 }
 0x960   :  { %v1021_v31 = vmax.f32 %v1016_v15, 0.0 }
 0x962   :  { %2038 = vmatmul.msk.f32.vlgmr.msra.gmra.mxu0 %vm1035_vm6, %v1021_v31  ;;  %v2185_v31 = vld [vmem:[%s3145_s7 + $0x1] ss:$0 sm:$0xff] }
 0x965   :  { %v1018_v16 = vpop.f32.mrf.mxu3 }
 0x966   :  { %v1019_v3 = vadd.f32 %v2181_v38, %v1018_v16 }
 0x968   :  { %v1022_v17 = vmax.f32 %v1019_v3, 0.0 }
 0x96a   :  { %2039 = vmatmul.msk.f32.gmra.mxu0 %vm1035_vm6, %v1022_v17 }
 0x9df   :  { %v1059_v21 = vpop.f32.mrf.mxu0 }
 0x9e0   :  { %v1060_v20 = vadd.f32 %v2182_v19, %v1059_v21 }
 0x9e2   :  { %v1065_v23 = vadd.f32 %v1060_v20, %v982_v5 }
 0x9e4   :  { %v1069_v24 = vsel %vm376_vm12, %v1065_v23, 0.0 }
 0x9e5   :  { %1070 = vadd.xlane.f32.xlu0 %v1069_v24 }
 0x9e7   :  { %v1062_v25 = vpop.f32.mrf.mxu0 }
 0x9e8   :  { %v1063_v26 = vadd.f32 %v2182_v19, %v1062_v25 }
 0x9ea   :  { %v1066_v28 = vadd.f32 %v1063_v26, %v983_v29 }
 0x9ec   :  { %v1072_v32 = vsel %vm376_vm12, %v1066_v28, 0.0 }
 0x9ed   :  { %1073 = vadd.xlane.f32.xlu0 %v1072_v32 }
 0xa58   :  { %v1071_v33 = vpop.xlane.xlu0 %1070 }
 0xa59   :  { %v1075_v35 = vmul.f32 %v1071_v33, %v2844_v18 }
 0xa5b   :  { %v1077_v36 = vsub.f32 %v1065_v23, %v1075_v35 }
 0xa5d   :  { %v1079_v37 = vmul.f32 %v1077_v36, %v1077_v36 }
 0xa5f   :  { %v1081_v39 = vsel %vm376_vm12, %v1079_v37, 0.0 }
 0xa60   :  { %1082 = vadd.xlane.f32.xlu0 %v1081_v39  ;;  %v1074_v40 = vpop.xlane.xlu0 %1073 }
 0xa61   :  { %v1076_v41 = vmul.f32 %v1074_v40, %v2844_v18 }
 0xa63   :  { %v1078_v42 = vsub.f32 %v1066_v28, %v1076_v41 }
 0xa65   :  { %v1080_v43 = vmul.f32 %v1078_v42, %v1078_v42 }
 0xa67   :  { %v1084_v44 = vsel %vm376_vm12, %v1080_v43, 0.0 }
 0xa68   :  { %1085 = vadd.xlane.f32.xlu2 %v1084_v44 }
 0xad3   :  { %v1083_v49 = vpop.xlane.xlu0 %1082 }
 0xad4   :  { %v1087_v50 = vmul.f32 %v1083_v49, %v2844_v18 }
 0xad6   :  { %v1089_v51 = vadd.f32 1e-05, %v1087_v50  ;;  %v2047_v50 = vld [vmem:[%s3146_s8 + $0x20] sm:$0xff] }
 0xad8   :  { %2240 = vrsqrt.f32 %v1089_v51  ;;  %vm1097_vm8 = vweird.f32 %v1089_v51 }
 0xadb   :  { %v1086_v52 = vpop.xlane.xlu2 %1085 }
 0xadc   :  { %v1088_v53 = vmul.f32 %v1086_v52, %v2844_v18 }
 0xade   :  { %v2241_v54 = vpop.eup %2240  ;;  %v1090_v55 = vadd.f32 1e-05, %v1088_v53 }
 0xadf   :  { %v1092_v56 = vmul.f32 %v2241_v54, %v1089_v51  ;;  %vm1098_vm7 = vweird.f32 %v2241_v54 }
 0xae0   :  { %2242 = vrsqrt.f32 %v1090_v55  ;;  %vm1099_vm9 = vmor %vm1097_vm8, %vm1098_vm7  ;;  %vm1107_vm11 = vweird.f32 %v1090_v55 }
 0xae1   :  { %v1093_v57 = vmul.f32 %v2241_v54, %v1092_v56 }
 0xae3   :  { %v1094_v58 = vmul.f32 0.5, %v1093_v57 }
 0xae5   :  { %v1095_v59 = vsub.f32 1.5, %v1094_v58 }
 0xae6   :  { %v2243_v60 = vpop.eup %2242 }
 0xae7   :  { %v1096_v62 = vmul.f32 %v2241_v54, %v1095_v59  ;;  %v1102_v63 = vmul.f32 %v2243_v60, %v1090_v55  ;;  %vm1108_vm10 = vweird.f32 %v2243_v60 }
 0xae8   :  { %vm1109_vm14 = vmor %vm1107_vm11, %vm1108_vm10 }
 0xae9   :  { %v1100_v1 = vsel %vm1099_vm9, %v2241_v54, %v1096_v62  ;;  %v1103_v5 = vmul.f32 %v2243_v60, %v1102_v63 }
 0xaea   :  { %v1111_v7 = vmul.f32 %v1100_v1, %v1077_v36 }
 0xaeb   :  { %v1104_v9 = vmul.f32 0.5, %v1103_v5 }
 0xaec   :  { %v1116_v10 = vmul.f32 %v2183_v0, %v1111_v7 }
 0xaed   :  { %v1105_v29 = vsub.f32 1.5, %v1104_v9 }
 0xaee   :  { %v2921_v11 = vadd.f32 %v2184_v8, %v1116_v10 }
 0xaef   :  { %v1106_v2 = vmul.f32 %v2243_v60, %v1105_v29 }
 0xaf0   :  { %2045 = vmatmul.msk.f32.vlgmr.msrb.gmra.mxu1 %vm376_vm12, %v2921_v11 }
 0xaf1   :  { %v1110_v12 = vsel %vm1109_vm14, %v2243_v60, %v1106_v2 }
 0xaf2   :  { %v1112_v38 = vmul.f32 %v1110_v12, %v1078_v42 }
 0xaf4   :  { %v1117_v14 = vmul.f32 %v2183_v0, %v1112_v38 }
 0xaf6   :  { %v2925_v15 = vadd.f32 %v2184_v8, %v1117_v14 }
 0xaf8   :  { %2046 = vmatmul.msk.f32.gmra.mxu1 %vm376_vm12, %v2925_v15 }
 0xb6d   :  { %v1156_v16 = vpop.f32.mrf.mxu1 }
 0xb6e   :  { %v1157_v3 = vadd.f32 %v2185_v31, %v1156_v16  ;;  %v2288_v16 = vld [vmem:[#allocation2] sm:$0xff] }
 0xb70   :  { %1169 = vrot.lane.b32.xlu1 %v1157_v3, %s2506_s25 }
 0xb75   :  { %v1159_v17 = vpop.f32.mrf.mxu1 }
 0xb76   :  { %v1160_v19 = vadd.f32 %v2185_v31, %v1159_v17 }
 0xb78   :  { %1171 = vrot.lane.b32.xlu0 %v1160_v19, %s2506_s25  ;;  %v2934_v21 = vpack.i.bf16 %v1157_v3, %v1160_v19 }
 0xb80   :  { %2157 = vrot.lane.b32.xlu0 %v2934_v21, %s2507_s18 }
 0xb88   :  { %1265 = vrot.lane.b32.xlu0 %v1157_v3, %s2508_s2 }
 0xb90   :  { %1261 = vrot.lane.b32.xlu0 %v1157_v3, %s2509_s6 }
 0xb98   :  { %1263 = vrot.lane.b32.xlu0 %v1160_v19, %s2509_s6 }
 0xba0   :  { %1548 = vrot.lane.b32.xlu0 %v1160_v19, %s2511_s27 }
 0xba8   :  { %1546 = vrot.lane.b32.xlu0 %v1157_v3, %s2511_s27 }
 0xbb0   :  { %1542 = vrot.lane.b32.xlu0 %v1157_v3, %s2512_s20 }
 0xbe2   :  { %v1170_v23 = vpop.permute.xlu1 %1169 }
 0xbea   :  { %v1172_v20 = vpop.permute.xlu0 %1171 }
 0xbeb   :  { %2051 = vmatpush.xpose.msk.msra.mxu2 %vm416_vm13, %v1172_v20  ;;  %v2289_v20 = vld [vmem:[#allocation2 + $0x8] sm:$0xff] }
 0xbef   :  { %2052 = vmatpush.xpose.msk.msra.mxu2 %vm416_vm13, %v1170_v23 }
 0xbf2   :  { %v2158_v24 = vpop.permute.xlu0 %2157  ;;  %2053 = vmatmul.msk.f32.vlgmr.msra.gmra.mxu2 %vm416_vm13, %v1157_v3 }
 0xbf3   :  { %v2159_v25 = vunpack.i.l.bf16 %v2158_v24  ;;  %v2160_v26 = vunpack.i.h.bf16 %v2158_v24 }
 0xbf5   :  { %1252 = vmatpush.msra.mxu3 %v2159_v25 }
 0xbf7   :  { %1253 = vmatpush.msra.mxu3 %v2160_v26 }
 0xbf9   :  { %1407 = vmatpush.msrb.mxu3 %v2047_v50 }
 0xbfa   :  { %2054 = vmatmul.msk.f32.gmra.mxu2 %vm416_vm13, %v1160_v19  ;;  %v1266_v49 = vpop.permute.xlu0 %1265 }
 0xc02   :  { %v1262_v51 = vpop.permute.xlu0 %1261 }
 0xc0a   :  { %v1264_v52 = vpop.permute.xlu0 %1263 }
 0xc12   :  { %v1549_v54 = vpop.permute.xlu0 %1548 }
 0xc1a   :  { %v1547_v59 = vpop.permute.xlu0 %1546 }
 0xc22   :  { %v1543_v14 = vpop.permute.xlu0 %1542 }
 0xc75   :  { %v1198_v28 = vpop.f32.mrf.mxu2 }
 0xc76   :  { %v1199_v32 = vadd.f32 %v1198_v28, %v2741_v30 }
 0xc78   :  { %v1204_v33 = vsel %vm194_vm0, %v1199_v32, -inf }
 0xc79   :  { %1205 = vmax.xlane.f32.xlu2 %v1204_v33 }
 0xc7d   :  { %v1201_v35 = vpop.f32.mrf.mxu2 }
 0xc7e   :  { %v1202_v36 = vadd.f32 %v1201_v35, %v2745_v34 }
 0xc80   :  { %v1207_v37 = vsel %vm194_vm0, %v1202_v36, -inf }
 0xc81   :  { %1208 = vmax.xlane.f32.xlu2 %v1207_v37 }
 0xcec   :  { %v1206_v39 = vpop.xlane.xlu2 %1205 }
 0xced   :  { %v1210_v40 = vsub.f32 %v1199_v32, %v1206_v39 }
 0xcef   :  { %v1212_v41 = vmul.f32 1.442695, %v1210_v40 }
 0xcf1   :  { %2244 = vpow2.f32 %v1212_v41 }
 0xcf4   :  { %v1209_v42 = vpop.xlane.xlu2 %1208 }
 0xcf5   :  { %v1211_v43 = vsub.f32 %v1202_v36, %v1209_v42 }
 0xcf7   :  { %v2245_v44 = vpop.eup %2244  ;;  %v1214_v45 = vmul.f32 1.442695, %v1211_v43 }
 0xcf8   :  { %v1216_v46 = vsel %vm194_vm0, %v2245_v44, 0.0 }
 0xcf9   :  { %2246 = vpow2.f32 %v1214_v45  ;;  %1217 = vadd.xlane.f32.xlu2 %v1216_v46 }
 0xcff   :  { %v2247_v47 = vpop.eup %2246 }
 0xd00   :  { %v1219_v48 = vsel %vm194_vm0, %v2247_v47, 0.0 }
 0xd01   :  { %1220 = vadd.xlane.f32.xlu1 %v1219_v48 }
 0xd11   :  { %1267 = vrot.lane.b32.xlu2 %v1160_v19, %s2508_s2 }
 0xd19   :  { %1421 = vrot.lane.b32.xlu2 %v1160_v19, %s2510_s26 }
 0xd1a   :  { %1417 = vrot.lane.b32.xlu1 %v1160_v19, %s2513_s29 }
 0xd21   :  { %1419 = vrot.lane.b32.xlu2 %v1157_v3, %s2510_s26 }
 0xd29   :  { %1415 = vrot.lane.b32.xlu2 %v1157_v3, %s2513_s29 }
 0xd31   :  { %1544 = vrot.lane.b32.xlu2 %v1160_v19, %s2512_s20 }
 0xd6c   :  { %v1218_v53 = vpop.xlane.xlu2 %1217 }
 0xd6d   :  { %2248 = vrcp.f32 %v1218_v53 }
 0xd73   :  { %v2249_v55 = vpop.eup %2248 }
 0xd74   :  { %v1224_v56 = vmul.f32 %v2249_v55, %v2245_v44  ;;  %v1221_v57 = vpop.xlane.xlu1 %1220  ;;  %v1268_v58 = vpop.permute.xlu2 %1267 }
 0xd75   :  { %2250 = vrcp.f32 %v1221_v57  ;;  %2057 = vmatpush.xpose.msk.msrb.mxu0 %vm416_vm13, %v1268_v58 }
 0xd76   :  { %2055 = vmatmul.msk.f32.vlgmr.msra.gmra.mxu3 %vm194_vm0, %v1224_v56 }
 0xd77   :  { %2075 = vmatpush.xpose.msk.msra.mxu3 %vm416_vm13, %v1549_v54 }
 0xd79   :  { %2058 = vmatpush.xpose.msk.msrb.mxu0 %vm416_vm13, %v1266_v49 }
 0xd7b   :  { %v2251_v60 = vpop.eup %2250  ;;  %2076 = vmatpush.xpose.msk.msra.mxu3 %vm416_vm13, %v1547_v59 }
 0xd7c   :  { %2059 = vmatmul.msk.f32.vlgmr.msrb.gmra.mxu0 %vm416_vm13, %v1262_v51  ;;  %v1422_v62 = vpop.permute.xlu2 %1421  ;;  %v1225_v63 = vmul.f32 %v2251_v60, %v2247_v47 }
 0xd7d   :  { %2067 = vmatpush.xpose.msk.msra.mxu0 %vm416_vm13, %v1422_v62 }
 0xd7e   :  { %2056 = vmatmul.msk.f32.gmra.mxu3 %vm194_vm0, %v1225_v63 }
 0xd84   :  { %2060 = vmatmul.msk.f32.gmra.mxu0 %vm416_vm13, %v1264_v52  ;;  %v1420_v0 = vpop.permute.xlu2 %1419 }
 0xd85   :  { %2068 = vmatpush.xpose.msk.msra.mxu0 %vm416_vm13, %v1420_v0 }
 0xd8c   :  { %v1416_v1 = vpop.permute.xlu2 %1415  ;;  %v1418_v5 = vpop.permute.xlu1 %1417 }
 0xd8d   :  { %2069 = vmatmul.msk.f32.vlgmr.msra.gmra.mxu0 %vm416_vm13, %v1416_v1 }
 0xd94   :  { %v1545_v17 = vpop.permute.xlu2 %1544 }
 0xd95   :  { %2070 = vmatmul.msk.f32.gmra.mxu0 %vm416_vm13, %v1418_v5 }
 0xdf9   :  { %v1255_v7 = vpop.f32.mrf.mxu3  ;;  %v1294_v8 = vpop.f32.mrf.mxu0 }
 0xdfa   :  { %v1295_v9 = vadd.f32 %v1294_v8, %v2741_v30  ;;  %2065 = vmatmul.msk.f32.vlgmr.msrb.gmra.mxu3 %vm416_vm13, %v1255_v7 }
 0xdfc   :  { %v1300_v10 = vsel %vm194_vm0, %v1295_v9, -inf }
 0xdfd   :  { %1301 = vmax.xlane.f32.xlu0 %v1300_v10 }
 0xe01   :  { %v1258_v29 = vpop.f32.mrf.mxu3  ;;  %v1297_v2 = vpop.f32.mrf.mxu0 }
 0xe02   :  { %v1298_v12 = vadd.f32 %v1297_v2, %v2745_v34  ;;  %2066 = vmatmul.msk.f32.gmra.mxu3 %vm416_vm13, %v1258_v29 }
 0xe04   :  { %v1303_v38 = vsel %vm194_vm0, %v1298_v12, -inf }
 0xe05   :  { %1304 = vmax.xlane.f32.xlu2 %v1303_v38 }
 0xe0a   :  { %v1448_v31 = vpop.f32.mrf.mxu0  ;;  %2077 = vmatmul.msk.f32.vlgmr.msra.gmra.mxu3 %vm416_vm13, %v1543_v14 }
 0xe0b   :  { %v1449_v30 = vadd.f32 %v2288_v16, %v1448_v31 }
 0xe0d   :  { %v1454_v3 = vsel %vm194_vm0, %v1449_v30, -inf }
 0xe0e   :  { %1455 = vmax.xlane.f32.xlu1 %v1454_v3 }
 0xe12   :  { %v1451_v19 = vpop.f32.mrf.mxu0  ;;  %2078 = vmatmul.msk.f32.gmra.mxu3 %vm416_vm13, %v1545_v17 }
 0xe13   :  { %v1452_v34 = vadd.f32 %v2289_v20, %v1451_v19 }
 0xe15   :  { %v1457_v23 = vsel %vm194_vm0, %v1452_v34, -inf }
 0xe16   :  { %1458 = vmax.xlane.f32.xlu0 %v1457_v23 }
 0xe70   :  { %v1302_v33 = vpop.xlane.xlu0 %1301 }
 0xe71   :  { %v1306_v37 = vsub.f32 %v1295_v9, %v1302_v33 }
 0xe73   :  { %v1308_v39 = vmul.f32 1.442695, %v1306_v37 }
 0xe78   :  { %v1305_v24 = vpop.xlane.xlu2 %1304 }
 0xe79   :  { %v1307_v25 = vsub.f32 %v1298_v12, %v1305_v24 }
 0xe7b   :  { %v1310_v26 = vmul.f32 1.442695, %v1307_v25 }
 0xe7d   :  { %2252 = vpow2.f32 %v1310_v26  ;;  %v2985_v28 = vpop.f32.mrf.mxu3 }
 0xe7e   :  { %2254 = vpow2.f32 %v1308_v39 }
 0xe81   :  { %v1456_v40 = vpop.xlane.xlu1 %1455 }
 0xe82   :  { %v1460_v43 = vsub.f32 %v1449_v30, %v1456_v40 }
 0xe83   :  { %v2987_v32 = vpop.eup %2252 }
 0xe84   :  { %v1315_v35 = vsel %vm194_vm0, %v2987_v32, 0.0  ;;  %v1462_v45 = vmul.f32 1.442695, %v1460_v43  ;;  %v2255_v47 = vpop.eup %2254 }
 0xe85   :  { %v2991_v36 = vpop.f32.mrf.mxu3  ;;  %1316 = vadd.xlane.f32.xlu1 %v1315_v35  ;;  %v1312_v51 = vsel %vm194_vm0, %v2255_v47, 0.0  ;;  %v2048_v35 = vld [vmem:[%s3146_s8 + $0x28] sm:$0xff] }
 0xe86   :  { %2256 = vpow2.f32 %v1462_v45  ;;  %1378 = vmatpush.msrb.mxu2 %v2048_v35 }
 0xe89   :  { %v1459_v46 = vpop.xlane.xlu0 %1458 }
 0xe8a   :  { %v1461_v50 = vsub.f32 %v1452_v34, %v1459_v46 }
 0xe8c   :  { %v1464_v53 = vmul.f32 1.442695, %v1461_v50  ;;  %v2257_v54 = vpop.eup %2256 }
 0xe8d   :  { %v1575_v41 = vpop.f32.mrf.mxu3  ;;  %v1466_v55 = vsel %vm194_vm0, %v2257_v54, 0.0 }
 0xe8e   :  { %v1576_v42 = vadd.f32 %v2288_v16, %v1575_v41  ;;  %2258 = vpow2.f32 %v1464_v53  ;;  %v2049_v41 = vld [vmem:[%s3146_s8 + $0x30] sm:$0xff] }
 0xe8f   :  { %1532 = vmatpush.msra.mxu2 %v2049_v41 }
 0xe90   :  { %v1581_v44 = vsel %vm194_vm0, %v1576_v42, -inf }
 0xe91   :  { %1582 = vmax.xlane.f32.xlu2 %v1581_v44  ;;  %v2050_v44 = vld [vmem:[%s3146_s8 + $0x38] sm:$0xff] }
 0xe94   :  { %v2259_v56 = vpop.eup %2258 }
 0xe95   :  { %v1578_v48 = vpop.f32.mrf.mxu3  ;;  %v1469_v57 = vsel %vm194_vm0, %v2259_v56, 0.0 }
 0xe96   :  { %v1579_v49 = vadd.f32 %v2289_v20, %v1578_v48 }
 0xe98   :  { %v1584_v52 = vsel %vm194_vm0, %v1579_v49, -inf }
 0xe99   :  { %1313 = vadd.xlane.f32.xlu2 %v1312_v51  ;;  %1585 = vmax.xlane.f32.xlu0 %v1584_v52 }
 0xe9e   :  { %2167 = vrot.lane.b32.xlu1 %v2934_v21, %s2516_s23  ;;  %s3186_s23 = sld [smem:[#allocation28_spill]] }
 0xea1   :  { %1467 = vadd.xlane.f32.xlu2 %v1466_v55 }
 0xea9   :  { %1470 = vadd.xlane.f32.xlu2 %v1469_v57 }
 0xead   :  { %2162 = vrot.lane.b32.xlu0 %v2934_v21, %s2514_s4 }
 0xec1   :  { %2172 = vrot.lane.b32.xlu2 %v2934_v21, %s2515_s0 }
 0xef8   :  { %v1317_v29 = vpop.xlane.xlu1 %1316 }
 0xf04   :  { %v1583_v58 = vpop.xlane.xlu2 %1582 }
 0xf05   :  { %v1587_v59 = vsub.f32 %v1576_v42, %v1583_v58 }
 0xf07   :  { %v1589_v60 = vmul.f32 1.442695, %v1587_v59 }
 0xf09   :  { %2260 = vpow2.f32 %v1589_v60 }
 0xf0c   :  { %v1586_v62 = vpop.xlane.xlu0 %1585  ;;  %v1314_v63 = vpop.xlane.xlu2 %1313 }
 0xf0d   :  { %v1588_v0 = vsub.f32 %v1579_v49, %v1586_v62 }
 0xf0f   :  { %v2261_v1 = vpop.eup %2260  ;;  %v1591_v5 = vmul.f32 1.442695, %v1588_v0 }
 0xf10   :  { %v1593_v7 = vsel %vm194_vm0, %v2261_v1, 0.0  ;;  %v2168_v14 = vpop.permute.xlu1 %2167 }
 0xf11   :  { %2262 = vpow2.f32 %v1591_v5  ;;  %1594 = vadd.xlane.f32.xlu0 %v1593_v7  ;;  %v2169_v30 = vunpack.i.l.bf16 %v2168_v14  ;;  %v2170_v19 = vunpack.i.h.bf16 %v2168_v14 }
 0xf12   :  { %2264 = vrcp.f32 %v1314_v63 }
 0xf13   :  { %2266 = vrcp.f32 %v1317_v29 }
 0xf14   :  { %v1468_v8 = vpop.xlane.xlu2 %1467 }
 0xf15   :  { %2268 = vrcp.f32 %v1468_v8 }
 0xf17   :  { %v2263_v9 = vpop.eup %2262 }
 0xf18   :  { %v1596_v10 = vsel %vm194_vm0, %v2263_v9, 0.0  ;;  %v2265_v12 = vpop.eup %2264 }
 0xf19   :  { %1597 = vadd.xlane.f32.xlu1 %v1596_v10  ;;  %v1320_v16 = vmul.f32 %v2265_v12, %v2255_v47  ;;  %v2267_v34 = vpop.eup %2266 }
 0xf1a   :  { %v1321_v23 = vmul.f32 %v2267_v34, %v2987_v32  ;;  %v2100_v34 = vld [vmem:[%s3152_s14 + $0x78] sm:$0xff] }
 0xf1b   :  { %v2269_v24 = vpop.eup %2268  ;;  %1805 = vmatpush.msrb.mxu3 %v2100_v34 }
 0xf1c   :  { %v1471_v21 = vpop.xlane.xlu2 %1470  ;;  %v1474_v25 = vmul.f32 %v2269_v24, %v2257_v54  ;;  %v2098_v24 = vld [vmem:[%s3152_s14 + $0x68] sm:$0xff] }
 0xf1d   :  { %2270 = vrcp.f32 %v1471_v21 }
 0xf1f   :  { %v2163_v2 = vpop.permute.xlu0 %2162 }
 0xf20   :  { %v2164_v38 = vunpack.i.l.bf16 %v2163_v2  ;;  %v2165_v31 = vunpack.i.h.bf16 %v2163_v2 }
 0xf22   :  { %1348 = vmatpush.msra.mxu1 %v2164_v38 }
 0xf23   :  { %v2271_v26 = vpop.eup %2270 }
 0xf24   :  { %1349 = vmatpush.msra.mxu1 %v2165_v31  ;;  %v2173_v3 = vpop.permute.xlu2 %2172  ;;  %v1475_v33 = vmul.f32 %v2271_v26, %v2259_v56  ;;  %v2186_v56 = vld [vmem:[%s3147_s9 + $0x1] ss:$0 sm:$0xff] }
 0xf25   :  { %v2174_v17 = vunpack.i.l.bf16 %v2173_v3  ;;  %2061 = vmatmul.msk.f32.vlgmr.msra.gmra.mxu1 %vm194_vm0, %v1320_v16  ;;  %v2175_v20 = vunpack.i.h.bf16 %v2173_v3  ;;  %v2088_v16 = vld [vmem:[%s3150_s12 + $0x30] sm:$0xff]  ;;  %v2086_v3 = vld [vmem:[%s3150_s12 + $0x20] sm:$0xff] }
 0xf26   :  { %1502 = vmatpush.msrb.mxu1 %v2169_v30  ;;  %v2087_v30 = vld [vmem:[%s3150_s12 + $0x28] sm:$0xff] }
 0xf27   :  { %1629 = vmatpush.msrb.mxu0 %v2174_v17 }
 0xf28   :  { %1503 = vmatpush.msrb.mxu1 %v2170_v19 }
 0xf29   :  { %1630 = vmatpush.msrb.mxu0 %v2175_v20 }
 0xf2a   :  { %1659 = vmatpush.msra.mxu1 %v2050_v44 }
 0xf2d   :  { %2062 = vmatmul.msk.f32.gmra.mxu1 %vm194_vm0, %v1321_v23  ;;  %v2099_v23 = vld [vmem:[%s3152_s14 + $0x70] sm:$0xff] }
 0xf2e   :  { %1806 = vmatpush.msrb.mxu3 %v2099_v23 }
 0xf30   :  { %1807 = vmatpush.msrb.mxu3 %v2098_v24 }
 0xf35   :  { %2071 = vmatmul.msk.f32.vlgmr.msrb.gmra.mxu1 %vm194_vm0, %v1474_v25 }
 0xf3d   :  { %2072 = vmatmul.msk.f32.gmra.mxu1 %vm194_vm0, %v1475_v33  ;;  %v2097_v33 = vld [vmem:[%s3152_s14 + $0x60] sm:$0xff] }
 0xf3e   :  { %1808 = vmatpush.msrb.mxu3 %v2097_v33 }
 0xf84   :  { %v1595_v37 = vpop.xlane.xlu0 %1594 }
 0xf85   :  { %2272 = vrcp.f32 %v1595_v37 }
 0xf8b   :  { %v2273_v39 = vpop.eup %2272 }
 0xf8c   :  { %v1601_v32 = vmul.f32 %v2273_v39, %v2261_v1  ;;  %v1598_v40 = vpop.xlane.xlu1 %1597  ;;  %v2096_v39 = vld [vmem:[%s3152_s14 + $0x58] sm:$0xff] }
 0xf8d   :  { %2274 = vrcp.f32 %v1598_v40  ;;  %1809 = vmatpush.msrb.mxu3 %v2096_v39 }
 0xf8e   :  { %2079 = vmatmul.msk.f32.vlgmr.msrb.gmra.mxu0 %vm194_vm0, %v1601_v32 }
 0xf93   :  { %v2275_v42 = vpop.eup %2274 }
 0xf94   :  { %v1602_v43 = vmul.f32 %v2275_v42, %v2263_v9 }
 0xf96   :  { %2080 = vmatmul.msk.f32.gmra.mxu0 %vm194_vm0, %v1602_v43 }
 0xfa2   :  { %v1351_v45 = vpop.f32.mrf.mxu1 }
 0xfa3   :  { %2063 = vmatmul.msk.f32.vlgmr.msrb.gmra.mxu2 %vm416_vm13, %v1351_v45 }
 0xfaa   :  { %v1354_v46 = vpop.f32.mrf.mxu1 }
 0xfab   :  { %2064 = vmatmul.msk.f32.gmra.mxu2 %vm416_vm13, %v1354_v46  ;;  %v2187_v46 = vld [vmem:[%s3148_s10 + $0x1] ss:$0 sm:$0xff] }
 0xfb2   :  { %v1505_v47 = vpop.f32.mrf.mxu1 }
 0xfb3   :  { %2073 = vmatmul.msk.f32.vlgmr.msra.gmra.mxu2 %vm416_vm13, %v1505_v47 }
 0xfba   :  { %v1508_v48 = vpop.f32.mrf.mxu1 }
 0xfbb   :  { %2074 = vmatmul.msk.f32.gmra.mxu2 %vm416_vm13, %v1508_v48 }
0x100b   :  { %v1632_v49 = vpop.f32.mrf.mxu0 }
0x100c   :  { %2081 = vmatmul.msk.f32.vlgmr.msra.gmra.mxu1 %vm416_vm13, %v1632_v49 }
0x1013   :  { %v1635_v50 = vpop.f32.mrf.mxu0 }
0x1014   :  { %2082 = vmatmul.msk.f32.gmra.mxu1 %vm416_vm13, %v1635_v50  ;;  %v2188_v50 = vld [vmem:[%s3149_s11 + $0x1] ss:$0 sm:$0xff] }
0x1026   :  { %v1380_v51 = vpop.f32.mrf.mxu2 }
0x1027   :  { %v1410_v54 = vadd.f32 %v2985_v28, %v1380_v51 }
0x102e   :  { %v1383_v52 = vpop.f32.mrf.mxu2 }
0x102f   :  { %v1413_v62 = vadd.f32 %v2991_v36, %v1383_v52 }
0x1036   :  { %v1534_v53 = vpop.f32.mrf.mxu2 }
0x1037   :  { %v1540_v55 = vadd.f32 %v1534_v53, %v1410_v54 }
0x103e   :  { %v1537_v60 = vpop.f32.mrf.mxu2 }
0x103f   :  { %v1541_v0 = vadd.f32 %v1537_v60, %v1413_v62  ;;  %v2095_v60 = vld [vmem:[%s3152_s14 + $0x50] sm:$0xff]  ;;  %v2094_v62 = vld [vmem:[%s3152_s14 + $0x48] sm:$0xff] }
0x1040   :  { %1810 = vmatpush.msrb.mxu3 %v2095_v60 }
0x1042   :  { %1811 = vmatpush.msrb.mxu3 %v2094_v62 }
0x1089   :  { %v1661_v57 = vpop.f32.mrf.mxu1 }
0x108a   :  { %v1667_v58 = vadd.f32 %v1661_v57, %v1540_v55 }
0x108c   :  { %v1674_v59 = vadd.f32 %v2186_v56, %v1667_v58 }
0x108e   :  { %v1676_v63 = vadd.f32 %v1674_v59, %v2921_v11 }
0x1090   :  { %v1682_v1 = vsel %vm376_vm12, %v1676_v63, 0.0 }
0x1091   :  { %1683 = vadd.xlane.f32.xlu2 %v1682_v1  ;;  %v1664_v5 = vpop.f32.mrf.mxu1 }
0x1092   :  { %v1668_v7 = vadd.f32 %v1664_v5, %v1541_v0  ;;  %v2189_v0 = vld [vmem:[%s3185_s17 + $0x1] ss:$0 sm:$0xff] }
0x1094   :  { %v1675_v28 = vadd.f32 %v2186_v56, %v1668_v7 }
0x1096   :  { %v1677_v8 = vadd.f32 %v1675_v28, %v2925_v15  ;;  %v2089_v15 = vld [vmem:[%s3150_s12 + $0x38] sm:$0xff] }
0x1097   :  { %1764 = vmatpush.msrb.mxu2 %v2089_v15 }
0x1098   :  { %v1685_v9 = vsel %vm376_vm12, %v1677_v8, 0.0 }
0x1099   :  { %1686 = vadd.xlane.f32.xlu0 %v1685_v9  ;;  %1765 = vmatpush.msrb.mxu2 %v2088_v16 }
0x109b   :  { %1766 = vmatpush.msrb.mxu2 %v2087_v30 }
0x109d   :  { %1767 = vmatpush.msrb.mxu2 %v2086_v3 }
0x1104   :  { %v1684_v10 = vpop.xlane.xlu2 %1683 }
0x1105   :  { %v1688_v29 = vmul.f32 %v1684_v10, %v2844_v18  ;;  %v2190_v10 = vld [vmem:[#allocation6 + $0x1] ss:$0 sm:$0xff] }
0x1107   :  { %v1690_v21 = vsub.f32 %v1676_v63, %v1688_v29  ;;  %v2093_v63 = vld [vmem:[%s3152_s14 + $0x40] sm:$0xff] }
0x1108   :  { %1812 = vmatpush.msrb.mxu3 %v2093_v63 }
0x1109   :  { %v1692_v2 = vmul.f32 %v1690_v21, %v1690_v21 }
0x110b   :  { %v1694_v36 = vsel %vm376_vm12, %v1692_v2, 0.0 }
0x110c   :  { %1695 = vadd.xlane.f32.xlu0 %v1694_v36  ;;  %v1687_v11 = vpop.xlane.xlu0 %1686 }
0x110d   :  { %v1689_v12 = vmul.f32 %v1687_v11, %v2844_v18 }
0x110f   :  { %v1691_v38 = vsub.f32 %v1677_v8, %v1689_v12 }
0x1111   :  { %v1693_v14 = vmul.f32 %v1691_v38, %v1691_v38 }
0x1113   :  { %v1697_v31 = vsel %vm376_vm12, %v1693_v14, 0.0 }
0x1114   :  { %1698 = vadd.xlane.f32.xlu1 %v1697_v31 }
0x117f   :  { %v1696_v17 = vpop.xlane.xlu0 %1695 }
0x1180   :  { %v1700_v19 = vmul.f32 %v1696_v17, %v2844_v18 }
0x1182   :  { %v1702_v20 = vadd.f32 1e-05, %v1700_v19 }
0x1184   :  { %2276 = vrsqrt.f32 %v1702_v20  ;;  %vm1710_vm15 = vweird.f32 %v1702_v20 }
0x1187   :  { %v1699_v25 = vpop.xlane.xlu1 %1698 }
0x1188   :  { %v1701_v26 = vmul.f32 %v1699_v25, %v2844_v18 }
0x118a   :  { %v2277_v35 = vpop.eup %2276  ;;  %v1703_v37 = vadd.f32 1e-05, %v1701_v26 }
0x118b   :  { %v1705_v32 = vmul.f32 %v2277_v35, %v1702_v20  ;;  %vm1711_vm0 = vweird.f32 %v2277_v35 }
0x118c   :  { %2278 = vrsqrt.f32 %v1703_v37  ;;  %vm1712_vm1 = vmor %vm1710_vm15, %vm1711_vm0  ;;  %vm1720_vm3 = vweird.f32 %v1703_v37 }
0x118d   :  { %v1706_v40 = vmul.f32 %v2277_v35, %v1705_v32 }
0x118f   :  { %v1707_v41 = vmul.f32 0.5, %v1706_v40 }
0x1191   :  { %v1708_v42 = vsub.f32 1.5, %v1707_v41 }
0x1192   :  { %v2279_v43 = vpop.eup %2278 }
0x1193   :  { %v1709_v44 = vmul.f32 %v2277_v35, %v1708_v42  ;;  %v1715_v45 = vmul.f32 %v2279_v43, %v1703_v37  ;;  %vm1721_vm2 = vweird.f32 %v2279_v43 }
0x1194   :  { %vm1722_vm4 = vmor %vm1720_vm3, %vm1721_vm2 }
0x1195   :  { %v1713_v47 = vsel %vm1712_vm1, %v2277_v35, %v1709_v44  ;;  %v1716_v48 = vmul.f32 %v2279_v43, %v1715_v45 }
0x1196   :  { %v1724_v49 = vmul.f32 %v1713_v47, %v1690_v21 }
0x1197   :  { %v1717_v51 = vmul.f32 0.5, %v1716_v48 }
0x1198   :  { %v1729_v52 = vmul.f32 %v2187_v46, %v1724_v49 }
0x1199   :  { %v1718_v53 = vsub.f32 1.5, %v1717_v51 }
0x119a   :  { %v1734_v54 = vadd.f32 %v2188_v50, %v1729_v52 }
0x119b   :  { %v1719_v55 = vmul.f32 %v2279_v43, %v1718_v53 }
0x119c   :  { %2091 = vmatmul.msk.f32.vlgmr.msrb.gmra.mxu2 %vm376_vm12, %v1734_v54 }
0x119d   :  { %v1723_v56 = vsel %vm1722_vm4, %v2279_v43, %v1719_v55 }
0x119e   :  { %v1725_v57 = vmul.f32 %v1723_v56, %v1691_v38 }
0x11a0   :  { %v1730_v58 = vmul.f32 %v2187_v46, %v1725_v57  ;;  %v2191_v46 = vld [vmem:[#allocation7 + $0x1] ss:$0 sm:$0xff] }
0x11a2   :  { %v1735_v59 = vadd.f32 %v2188_v50, %v1730_v58  ;;  %v2192_v50 = vld [vmem:[#allocation9 + $0x1] ss:$0 sm:$0xff] }
0x11a4   :  { %2092 = vmatmul.msk.f32.gmra.mxu2 %vm376_vm12, %v1735_v59 }
0x121f   :  { %v1769_v1 = vpop.f32.mrf.mxu2 }
0x1220   :  { %v1770_v5 = vadd.f32 %v2189_v0, %v1769_v1 }
0x1222   :  { %v1775_v7 = vmax.f32 %v1770_v5, 0.0 }
0x1224   :  { %2101 = vmatmul.msk.f32.vlgmr.msrb.gmra.mxu3 %vm1035_vm6, %v1775_v7 }
0x1227   :  { %v1772_v28 = vpop.f32.mrf.mxu2 }
0x1228   :  { %v1773_v8 = vadd.f32 %v2189_v0, %v1772_v28 }
0x122a   :  { %v1776_v9 = vmax.f32 %v1773_v8, 0.0 }
0x122c   :  { %2102 = vmatmul.msk.f32.gmra.mxu3 %vm1035_vm6, %v1776_v9 }
0x12a7   :  { %v1814_v29 = vpop.f32.mrf.mxu3 }
0x12a8   :  { %v1815_v21 = vadd.f32 %v2190_v10, %v1814_v29 }
0x12aa   :  { %v1820_v2 = vadd.f32 %v1815_v21, %v1734_v54  ;;  %v1938_v21 = vld [vmem:[%s3186_s23 + $0x10] sm:$0xff] }
0x12ac   :  { %v1826_v36 = vsel %vm376_vm12, %v1820_v2, 0.0 }
0x12ad   :  { %1827 = vadd.xlane.f32.xlu0 %v1826_v36  ;;  %v1936_v36 = vld [vmem:[%s3186_s23] sm:$0xff] }
0x12af   :  { %v1817_v11 = vpop.f32.mrf.mxu3 }
0x12b0   :  { %v1818_v12 = vadd.f32 %v2190_v10, %v1817_v11 }
0x12b2   :  { %v1821_v38 = vadd.f32 %v1818_v12, %v1735_v59 }
0x12b4   :  { %v1829_v14 = vsel %vm376_vm12, %v1821_v38, 0.0 }
0x12b5   :  { %1830 = vadd.xlane.f32.xlu1 %v1829_v14 }
0x1320   :  { %v1828_v31 = vpop.xlane.xlu0 %1827 }
0x1321   :  { %v1832_v15 = vmul.f32 %v1828_v31, %v2844_v18 }
0x1323   :  { %v1834_v16 = vsub.f32 %v1820_v2, %v1832_v15  ;;  %v1937_v2 = vld [vmem:[%s3186_s23 + $0x8] sm:$0xff] }
0x1325   :  { %v1836_v30 = vmul.f32 %v1834_v16, %v1834_v16 }
0x1327   :  { %v1838_v3 = vsel %vm376_vm12, %v1836_v30, 0.0 }
0x1328   :  { %v1831_v17 = vpop.xlane.xlu1 %1830  ;;  %1839 = vadd.xlane.f32.xlu0 %v1838_v3 }
0x1329   :  { %v1833_v19 = vmul.f32 %v1831_v17, %v2844_v18 }
0x132b   :  { %v1835_v20 = vsub.f32 %v1821_v38, %v1833_v19 }
0x132d   :  { %v1837_v34 = vmul.f32 %v1835_v20, %v1835_v20 }
0x132f   :  { %v1841_v23 = vsel %vm376_vm12, %v1837_v34, 0.0 }
0x1330   :  { %1842 = vadd.xlane.f32.xlu2 %v1841_v23  ;;  %v2193_v23 = vld [vmem:[#allocation10] ss:$0 sm:$0xff] }
0x139b   :  { %v1840_v24 = vpop.xlane.xlu0 %1839 }
0x139c   :  { %v1844_v25 = vmul.f32 %v1840_v24, %v2844_v18 }
0x139e   :  { %v1846_v26 = vadd.f32 1e-05, %v1844_v25 }
0x13a0   :  { %2280 = vrsqrt.f32 %v1846_v26  ;;  %vm1854_vm6 = vweird.f32 %v1846_v26 }
0x13a3   :  { %v1843_v33 = vpop.xlane.xlu2 %1842 }
0x13a4   :  { %v1845_v35 = vmul.f32 %v1843_v33, %v2844_v18  ;;  %v2194_v33 = vld [vmem:[#allocation12] ss:$0 sm:$0xff] }
0x13a6   :  { %v2281_v37 = vpop.eup %2280  ;;  %v1847_v39 = vadd.f32 1e-05, %v1845_v35 }
0x13a7   :  { %v1849_v32 = vmul.f32 %v2281_v37, %v1846_v26  ;;  %vm1855_vm5 = vweird.f32 %v2281_v37 }
0x13a8   :  { %2282 = vrsqrt.f32 %v1847_v39  ;;  %vm1856_vm7 = vmor %vm1854_vm6, %vm1855_vm5  ;;  %vm1864_vm9 = vweird.f32 %v1847_v39 }
0x13a9   :  { %v1850_v40 = vmul.f32 %v2281_v37, %v1849_v32 }
0x13ab   :  { %v1851_v41 = vmul.f32 0.5, %v1850_v40 }
0x13ad   :  { %v1852_v42 = vsub.f32 1.5, %v1851_v41 }
0x13ae   :  { %v2283_v43 = vpop.eup %2282 }
0x13af   :  { %v1853_v44 = vmul.f32 %v2281_v37, %v1852_v42  ;;  %v1859_v45 = vmul.f32 %v2283_v43, %v1847_v39  ;;  %vm1865_vm8 = vweird.f32 %v2283_v43 }
0x13b0   :  { %vm1866_vm10 = vmor %vm1864_vm9, %vm1865_vm8 }
0x13b1   :  { %v1860_v47 = vmul.f32 %v2283_v43, %v1859_v45  ;;  %v1857_v48 = vsel %vm1856_vm7, %v2281_v37, %v1853_v44  ;;  %v2195_v44 = vld [vmem:[#allocation13] ss:$0 sm:$0xff] }
0x13b2   :  { %v1868_v49 = vmul.f32 %v1857_v48, %v1834_v16 }
0x13b3   :  { %v1861_v51 = vmul.f32 0.5, %v1860_v47 }
0x13b4   :  { %v1873_v52 = vmul.f32 %v2191_v46, %v1868_v49 }
0x13b5   :  { %v1862_v53 = vsub.f32 1.5, %v1861_v51 }
0x13b6   :  { %v1878_v54 = vadd.f32 %v2192_v50, %v1873_v52 }
0x13b7   :  { %v1863_v55 = vmul.f32 %v2283_v43, %v1862_v53 }
0x13b8   :  { %v1882_v56 = vsel %vm376_vm12, %v1878_v54, 0.0 }
0x13b9   :  { %1883 = vadd.xlane.f32.xlu1 %v1882_v56  ;;  %v1867_v57 = vsel %vm1866_vm10, %v2283_v43, %v1863_v55 }
0x13ba   :  { %v1869_v58 = vmul.f32 %v1867_v57, %v1835_v20 }
0x13bc   :  { %v1874_v59 = vmul.f32 %v2191_v46, %v1869_v58 }
0x13be   :  { %v1879_v60 = vadd.f32 %v2192_v50, %v1874_v59 }
0x13c0   :  { %v1885_v62 = vsel %vm376_vm12, %v1879_v60, 0.0 }
0x13c1   :  { %1886 = vadd.xlane.f32.xlu0 %v1885_v62 }
0x13d5   :  { %1979 = vrot.lane.b32.xlu0 %v2671_v4, %s2509_s6  ;;  %v1939_v4 = vld [vmem:[%s3186_s23 + $0x18] sm:$0xff] }
0x13d6   :  { %1962 = vmatpush.msra.mxu0 %v1939_v4 }
0x13d8   :  { %1963 = vmatpush.msra.mxu0 %v1938_v21 }
0x13da   :  { %1964 = vmatpush.msra.mxu0 %v1937_v2 }
0x13dc   :  { %1965 = vmatpush.msra.mxu0 %v1936_v36 }
0x142c   :  { %v1884_v63 = vpop.xlane.xlu1 %1883 }
0x142d   :  { %v1888_v0 = vmul.f32 %v1884_v63, %v2844_v18 }
0x142f   :  { %v1890_v1 = vsub.f32 %v1878_v54, %v1888_v0 }
0x1431   :  { %v1892_v5 = vmul.f32 %v1890_v1, %v1890_v1 }
0x1433   :  { %v1894_v7 = vsel %vm376_vm12, %v1892_v5, 0.0 }
0x1434   :  { %1895 = vadd.xlane.f32.xlu2 %v1894_v7  ;;  %v1887_v28 = vpop.xlane.xlu0 %1886 }
0x1435   :  { %v1889_v8 = vmul.f32 %v1887_v28, %v2844_v18 }
0x1437   :  { %v1891_v9 = vsub.f32 %v1879_v60, %v1889_v8 }
0x1439   :  { %v1893_v10 = vmul.f32 %v1891_v9, %v1891_v9 }
0x143b   :  { %v1897_v29 = vsel %vm376_vm12, %v1893_v10, 0.0 }
0x143c   :  { %1898 = vadd.xlane.f32.xlu1 %v1897_v29 }
0x1447   :  { %v1980_v49 = vpop.permute.xlu0 %1979 }
0x144c   :  { %1981 = vrot.lane.b32.xlu2 %v2675_v6, %s2509_s6 }
0x14a7   :  { %v1896_v6 = vpop.xlane.xlu2 %1895 }
0x14a8   :  { %v1900_v11 = vmul.f32 %v1896_v6, %v2844_v18 }
0x14aa   :  { %v1902_v12 = vadd.f32 1e-05, %v1900_v11 }
0x14ac   :  { %2284 = vrsqrt.f32 %v1902_v12  ;;  %vm1910_vm14 = vweird.f32 %v1902_v12 }
0x14af   :  { %v1899_v38 = vpop.xlane.xlu1 %1898  ;;  %v1982_v55 = vpop.permute.xlu2 %1981 }
0x14b0   :  { %v1901_v14 = vmul.f32 %v1899_v38, %v2844_v18 }
0x14b2   :  { %v2285_v31 = vpop.eup %2284  ;;  %v1903_v15 = vadd.f32 1e-05, %v1901_v14 }
0x14b3   :  { %v1905_v16 = vmul.f32 %v2285_v31, %v1902_v12  ;;  %vm1911_vm11 = vweird.f32 %v2285_v31 }
0x14b4   :  { %2286 = vrsqrt.f32 %v1903_v15  ;;  %vm1912_vm0 = vmor %vm1910_vm14, %vm1911_vm11  ;;  %vm1920_vm1 = vweird.f32 %v1903_v15 }
0x14b5   :  { %v1906_v30 = vmul.f32 %v2285_v31, %v1905_v16 }
0x14b7   :  { %v1907_v3 = vmul.f32 0.5, %v1906_v30 }
0x14b9   :  { %v1908_v17 = vsub.f32 1.5, %v1907_v3 }
0x14ba   :  { %v2287_v19 = vpop.eup %2286 }
0x14bb   :  { %v1909_v20 = vmul.f32 %v2285_v31, %v1908_v17  ;;  %v1915_v34 = vmul.f32 %v2287_v19, %v1903_v15  ;;  %vm1921_vm15 = vweird.f32 %v2287_v19 }
0x14bc   :  { %vm1922_vm2 = vmor %vm1920_vm1, %vm1921_vm15 }
0x14bd   :  { %v1913_v24 = vsel %vm1912_vm0, %v2285_v31, %v1909_v20  ;;  %v1916_v25 = vmul.f32 %v2287_v19, %v1915_v34 }
0x14be   :  { %v1924_v26 = vmul.f32 %v1913_v24, %v1890_v1 }
0x14bf   :  { %v1917_v35 = vmul.f32 0.5, %v1916_v25 }
0x14c0   :  { %v1929_v18 = vmul.f32 %v2193_v23, %v1924_v26 }
0x14c1   :  { %v1918_v37 = vsub.f32 1.5, %v1917_v35 }
0x14c2   :  { %v1934_v39 = vadd.f32 %v2194_v33, %v1929_v18 }
0x14c3   :  { %v1919_v32 = vmul.f32 %v2287_v19, %v1918_v37 }
0x14c4   :  { %2103 = vmatmul.msk.f32.vlgmr.msra.gmra.mxu0 %vm376_vm12, %v1934_v39 }
0x14c5   :  { %v1923_v40 = vsel %vm1922_vm2, %v2287_v19, %v1919_v32 }
0x14c6   :  { %v1925_v41 = vmul.f32 %v1923_v40, %v1891_v9 }
0x14c8   :  { %v1930_v42 = vmul.f32 %v2193_v23, %v1925_v41 }
0x14ca   :  { %v1935_v43 = vadd.f32 %v2194_v33, %v1930_v42 }
0x14cc   :  { %2104 = vmatmul.msk.f32.gmra.mxu0 %vm376_vm12, %v1935_v43 }
0x1541   :  { %v1967_v45 = vpop.f32.mrf.mxu0 }
0x1542   :  { %v1968_v46 = vadd.f32 %v2195_v44, %v1967_v45 }
0x1544   :  { %v1973_v47 = vmul.f32 %v1968_v46, %v2708_v61 }
0x1546   :  { %v1975_v48 = vadd.f32 %v1973_v47, %v2687_v22 }
0x1548   :  { %v1985_v50 = vadd.f32 %v1980_v49, %v1975_v48 }
0x1549   :  { %v1970_v51 = vpop.f32.mrf.mxu0 }
0x154a   :  { %1987 = vst.msk [vmem:[%s3187_s28] sm:$0xff] %vm416_vm13, %v1985_v50  ;;  %v1971_v52 = vadd.f32 %v2195_v44, %v1970_v51 }
0x154c   :  { %v1974_v53 = vmul.f32 %v1971_v52, %v2712_v13 }
0x154e   :  { %v1976_v54 = vadd.f32 %v1974_v53, %v2691_v27 }
0x1550   :  { %v1986_v56 = vadd.f32 %v1982_v55, %v1976_v54 }
0x1552   :  { %1988 = vst.msk [vmem:[%s3187_s28 + $0x8] sm:$0xff] %vm416_vm13, %v1986_v56 }
0x1553   :  { %1993 = vsyncpa [#allocation3], 1 }
0x1554   :  { %1994 = vsyncpa [#allocation5], 1 }
0x1555   :  { %1995 = vsyncpa [#allocation8], 1 }
0x1556   :  { %1996 = vsyncpa [#allocation11], 1 }
0x1557   :  { %1997 = vsyncpa [#allocation14], 1 }

</bundles_post_ra>
